<compile_context>
chip_gen: v7x
topology: tpu7x:2x2x1
jax: 0.10.0
libtpu: 0.0.40
codegen_flags: <defaults>
</compile_context>

<pallas_src>
import functools

import jax
import jax.numpy as jnp
from jax.experimental import pallas as pl
from jax.experimental.pallas import tpu as pltpu

HEADS1 = 8      # conv1 heads
F1 = 8          # conv1 per-head features
HEAD_PAD = 8    # head axis padding used for both layers' alpha matrices


def _round_up(x, m):
    return (x + m - 1) // m * m


def _gat_fused_kernel(x_ref, w1_ref, asrc1t_ref, adst1_ref, b1_ref,
                      w2_ref, asrc2t_ref, adst2_ref, b2_ref, adj_ref,
                      out_ref,
                      h1_sc, x1_sc, h2_sc,
                      alsrc1_sc, aldst1_sc, alsrc2_sc, aldst2_sc,
                      *, heads, f1, out_dim, tile):
    ph = pl.program_id(0)              # 0 = conv1, 1 = conv2
    blk = pl.program_id(1)             # destination-row block
    start = pl.multiple_of(blk * tile, tile)

    neg_big = jnp.float32(-1e30)
    neg_slope = jnp.float32(0.2)       # GATConv default negative_slope

    # adj tile for this dst block (int8 0/1, adj[dst, src]); cast once, reuse for both phases.
    adj = adj_ref[...].astype(jnp.float32)          # [tile, N]
    edge = adj > 0.0

    def masked_attention(a_d, a_s):
        # a_d: [tile, 1] (per-destination), a_s: [1, N] (per-source)
        e = a_d + a_s
        e = jnp.where(e >= 0.0, e, neg_slope * e)   # LeakyReLU(0.2)
        e = jnp.where(edge, e, neg_big)
        m = jnp.max(e, axis=1, keepdims=True)
        # Masked entries underflow to exp(-1e30 - m) == 0.  Self-loops are required,
        # so every valid row has at least one unmasked logit -> denom >= 1, no NaN.
        p = jnp.exp(e - m)
        denom = jnp.sum(p, axis=1, keepdims=True)
        return p * pl.reciprocal(denom, approx=True)

    # ---- phase 0, first block: project all nodes + attention logits (layer 1) ----
    @pl.when(jnp.logical_and(ph == 0, blk == 0))
    def _():
        h1 = jnp.dot(x_ref[...], w1_ref[...], preferred_element_type=jnp.float32)
        h1_sc[...] = h1                                                    # [N, heads*f1]
        alsrc1_sc[...] = jnp.einsum('hd,nd->hn', asrc1t_ref[...], h1,
                                    preferred_element_type=jnp.float32)    # [heads, N]
        aldst1_sc[...] = jnp.dot(h1, adst1_ref[...],
                                 preferred_element_type=jnp.float32)       # [N, heads]

    # ---- phase 0: layer-1 attention + aggregation for one dst block ----
    @pl.when(ph == 0)
    def _():
        h1 = h1_sc[...]
        a_d_blk = aldst1_sc[pl.ds(start, tile), :]                         # [tile, heads]
        outs = []
        for hd in range(heads):
            att = masked_attention(a_d_blk[:, hd:hd + 1],
                                   alsrc1_sc[hd:hd + 1, :])                # [tile, N]
            outs.append(jnp.dot(att, h1[:, hd * f1:(hd + 1) * f1],
                                preferred_element_type=jnp.float32))       # [tile, f1]
        y = jnp.concatenate(outs, axis=-1) + b1_ref[...]                   # [tile, heads*f1]
        x1_sc[pl.ds(start, tile), :] = jnp.maximum(y, 0.0)                 # ReLU, stays in VMEM

    # ---- phase 1, first block: project all nodes + attention logits (layer 2) ----
    @pl.when(jnp.logical_and(ph == 1, blk == 0))
    def _():
        h2 = jnp.dot(x1_sc[...], w2_ref[...], preferred_element_type=jnp.float32)
        h2_sc[...] = h2                                                    # [N, OUT_PAD]
        alsrc2_sc[...] = jnp.einsum('hd,nd->hn', asrc2t_ref[...], h2,
                                    preferred_element_type=jnp.float32)    # [HEAD_PAD, N]
        aldst2_sc[...] = jnp.dot(h2, adst2_ref[...],
                                 preferred_element_type=jnp.float32)       # [N, HEAD_PAD]

    # ---- phase 1: layer-2 attention + aggregation + log_softmax for one dst block ----
    @pl.when(ph == 1)
    def _():
        h2 = h2_sc[...]
        a_d_blk = aldst2_sc[pl.ds(start, tile), :]                         # [tile, HEAD_PAD]
        att = masked_attention(a_d_blk[:, 0:1], alsrc2_sc[0:1, :])         # [tile, N]
        z = jnp.dot(att, h2, preferred_element_type=jnp.float32) + b2_ref[...]   # [tile, OUT_PAD]
        # log_softmax over the valid (unpadded) columns only.
        col = jax.lax.broadcasted_iota(jnp.int32, z.shape, 1)
        valid = col < out_dim
        zm = jnp.where(valid, z, neg_big)
        mx = jnp.max(zm, axis=1, keepdims=True)
        lse = mx + jnp.log(jnp.sum(jnp.exp(zm - mx), axis=1, keepdims=True))
        out_ref[...] = jnp.where(valid, z - lse, 0.0).astype(out_ref.dtype)


def _block_attn_rows(att, d_model, head_pad):
    """[heads, f_out] attention vectors -> [head_pad, d_model] block-structured matrix.

    Row h carries att[h] in feature columns h*f_out:(h+1)*f_out, zeros elsewhere, so
    (features @ result.T)[:, h] == per-head dot products, done on the MXU."""
    heads, f_out = att.shape
    m = jnp.zeros((head_pad, d_model), jnp.float32)
    for h in range(heads):
        m = m.at[h, h * f_out:(h + 1) * f_out].set(att[h])
    return m


@functools.partial(jax.jit, static_argnames=("out_dim",))
def gat_forward(params, x, adj, *, out_dim):
    """adj: [N, N] adjacency with adj[dst, src] != 0 for edge src->dst.
    Self-loops are REQUIRED (GATConv add_self_loops=True); eval-mode forward."""
    n, f_in = x.shape
    d1 = HEADS1 * F1                                  # 64
    out_pad = max(128, _round_up(out_dim, 128))       # lane-dense layer-2 width

    # --- destination-row tiling (int8 adj tiles need a 32-multiple unless full) ---
    if n <= 128:
        n_pad = _round_up(n, 8)
        tile = n_pad
    else:
        tile = 128
        n_pad = _round_up(n, tile)
    nb = n_pad // tile

    # --- pad node features / adjacency; ship adjacency as int8 (4x less HBM) ---
    x_p = jnp.pad(x.astype(jnp.float32), ((0, n_pad - n), (0, 0)))
    adj_i8 = (adj != 0).astype(jnp.int8)
    adj_p = jnp.pad(adj_i8, ((0, n_pad - n), (0, n_pad - n)))

    # --- wrapper-side parameter layout (all cheap XLA ops, outside the kernel) ---
    w1 = params["w1"].astype(jnp.float32)                         # [f_in, 64]
    b1 = params["b1"].astype(jnp.float32)                         # [1, 64]
    a_src1_t = _block_attn_rows(params["as1"], d1, HEAD_PAD)      # [8, 64]
    a_dst1 = _block_attn_rows(params["ad1"], d1, HEAD_PAD).T      # [64, 8]

    w2_p = jnp.zeros((d1, out_pad), jnp.float32).at[:, :out_dim].set(params["w2"])
    b2_p = jnp.zeros((1, out_pad), jnp.float32).at[:, :out_dim].set(params["b2"])
    a_src2_t = _block_attn_rows(params["as2"], out_pad, HEAD_PAD)  # [8, out_pad] (row 0 real)
    a_dst2 = _block_attn_rows(params["ad2"], out_pad, HEAD_PAD).T  # [out_pad, 8] (col 0 real)

    kernel = functools.partial(_gat_fused_kernel, heads=HEADS1, f1=F1,
                               out_dim=out_dim, tile=tile)

    def full_spec(shape):
        return pl.BlockSpec(shape, lambda ph, i: (0, 0))

    grid_spec = pltpu.PrefetchScalarGridSpec(
        num_scalar_prefetch=0,
        grid=(2, nb),                                  # (layer phase, dst-row block)
        in_specs=[
            full_spec((n_pad, f_in)),                  # x            (resident whole grid)
            full_spec((f_in, d1)),                     # w1
            full_spec((HEAD_PAD, d1)),                 # A_src1^T
            full_spec((d1, HEAD_PAD)),                 # A_dst1
            full_spec((1, d1)),                        # b1
            full_spec((d1, out_pad)),                  # w2 (padded)
            full_spec((HEAD_PAD, out_pad)),            # A_src2^T
            full_spec((out_pad, HEAD_PAD)),            # A_dst2
            full_spec((1, out_pad)),                   # b2 (padded)
            pl.BlockSpec((tile, n_pad), lambda ph, i: (i, 0)),   # adj dst-row tile
        ],
        # Phase 0 parks on block 0 (overwritten at step (1,0)), phase 1 writes block i:
        # avoids writing back untouched output tiles during phase 0.
        out_specs=pl.BlockSpec((tile, out_pad), lambda ph, i: (ph * i, 0)),
        scratch_shapes=[
            pltpu.VMEM((n_pad, d1), jnp.float32),       # h1 = x @ W1
            pltpu.VMEM((n_pad, d1), jnp.float32),       # x1 = relu(conv1) (never hits HBM)
            pltpu.VMEM((n_pad, out_pad), jnp.float32),  # h2 = x1 @ W2
            pltpu.VMEM((HEAD_PAD, n_pad), jnp.float32), # alpha_src layer 1 (row per head)
            pltpu.VMEM((n_pad, HEAD_PAD), jnp.float32), # alpha_dst layer 1
            pltpu.VMEM((HEAD_PAD, n_pad), jnp.float32), # alpha_src layer 2 (row 0 used)
            pltpu.VMEM((n_pad, HEAD_PAD), jnp.float32), # alpha_dst layer 2 (col 0 used)
        ],
    )

    out = pl.pallas_call(
        kernel,
        out_shape=jax.ShapeDtypeStruct((n_pad, out_pad), jnp.float32),
        grid_spec=grid_spec,
        compiler_params=pltpu.CompilerParams(
            # Phase 1 depends on all phase-0 blocks through VMEM scratch -> sequential grid.
            dimension_semantics=("arbitrary", "arbitrary"),
            vmem_limit_bytes=48 * 1024 * 1024,
        ),
    )(x_p, w1, a_src1_t, a_dst1, b1, w2_p, a_src2_t, a_dst2, b2_p, adj_p)

    return out[:n, :out_dim]


def init_gat_params(key, in_dim, out_dim):
    """Deterministic glorot-uniform init matching GATConv parameter shapes."""
    def glorot(k, shape, fan_in, fan_out):
        lim = jnp.sqrt(6.0 / (fan_in + fan_out))
        return jax.random.uniform(k, shape, jnp.float32, -lim, lim)

    keys = jax.random.split(key, 8)
    d1 = HEADS1 * F1
    return {
        # conv1: GATConv(in_dim, 8, heads=8)
        "w1": glorot(keys[0], (in_dim, d1), in_dim, d1),
        "as1": glorot(keys[1], (HEADS1, F1), F1, 1),
        "ad1": glorot(keys[2], (HEADS1, F1), F1, 1),
        "b1": jnp.zeros((1, d1), jnp.float32),
        # conv2: GATConv(64, out_dim, heads=1)
        "w2": glorot(keys[3], (d1, out_dim), d1, out_dim),
        "as2": glorot(keys[4], (1, out_dim), out_dim, 1),
        "ad2": glorot(keys[5], (1, out_dim), out_dim, 1),
        "b2": jnp.zeros((1, out_dim), jnp.float32),
    }


def _gat_reference(params, x, adj, out_dim):
    """Pure-JAX dense reference (eval mode) for validation."""
    edge = adj != 0

    def conv(xin, w, a_s, a_d, b, heads, f_out):
        h = xin @ w
        outs = []
        for hd in range(heads):
            hh = h[:, hd * f_out:(hd + 1) * f_out]
            als = hh @ a_s[hd]
            ald = hh @ a_d[hd]
            e = ald[:, None] + als[None, :]
            e = jnp.where(e >= 0, e, 0.2 * e)
            e = jnp.where(edge, e, -jnp.inf)
            att = jax.nn.softmax(e, axis=1)
            outs.append(att @ hh)
        return jnp.concatenate(outs, -1) + b

    x1 = jax.nn.relu(conv(x, params["w1"], params["as1"], params["ad1"],
                          params["b1"], HEADS1, F1))
    x2 = conv(x1, params["w2"], params["as2"], params["ad2"],
              params["b2"], 1, out_dim)
    return jax.nn.log_softmax(x2, axis=1)


if __name__ == "__main__":
    N, IN_DIM, OUT_DIM = 16, 16, 8

    key = jax.random.PRNGKey(0)
    k_x, k_p = jax.random.split(key)

    # Node features (data.x)
    x = jax.random.normal(k_x, (N, IN_DIM), jnp.float32)

    # Deterministic undirected ring graph -> dense int8 adjacency (adj[dst, src]) + self-loops.
    src = jnp.arange(N)
    dst = (src + 1) % N
    adj = jnp.zeros((N, N), jnp.int8)
    adj = adj.at[dst, src].set(1)
    adj = adj.at[src, dst].set(1)
    adj = adj.at[jnp.arange(N), jnp.arange(N)].set(1)   # self-loops (required invariant)

    params = init_gat_params(k_p, IN_DIM, OUT_DIM)

    out = gat_forward(params, x, adj, out_dim=OUT_DIM)
    out = jax.block_until_ready(out)

    assert out.shape == (N, OUT_DIM)
    assert bool(jnp.all(jnp.isfinite(out)))
    # log_softmax rows must (log-)sum to ~0
    assert jnp.allclose(jnp.sum(jnp.exp(out), axis=1), 1.0, atol=1e-4)
    # cross-check against pure-JAX reference (loose tol: approx reciprocal in softmax)
    ref = _gat_reference(params, x, adj.astype(jnp.float32), OUT_DIM)
    assert jnp.allclose(out, ref, atol=5e-2, rtol=5e-2)
    print("KERNEL_OK")
</pallas_src>

<mosaic_0001>
module attributes {stable_mosaic.version = 11 : i64} {
  func.func @_gat_fused_kernel(%arg0: i32, %arg1: i32, %arg2: memref<16x16xf32, #tpu.memory_space<vmem>>, %arg3: memref<16x64xf32, #tpu.memory_space<vmem>>, %arg4: memref<8x64xf32, #tpu.memory_space<vmem>>, %arg5: memref<64x8xf32, #tpu.memory_space<vmem>>, %arg6: memref<1x64xf32, #tpu.memory_space<vmem>>, %arg7: memref<64x128xf32, #tpu.memory_space<vmem>>, %arg8: memref<8x128xf32, #tpu.memory_space<vmem>>, %arg9: memref<128x8xf32, #tpu.memory_space<vmem>>, %arg10: memref<1x128xf32, #tpu.memory_space<vmem>>, %arg11: memref<16x16xi8, #tpu.memory_space<vmem>>, %arg12: memref<16x128xf32, #tpu.memory_space<vmem>>, %arg13: memref<16x64xf32, #tpu.memory_space<vmem>>, %arg14: memref<16x64xf32, #tpu.memory_space<vmem>>, %arg15: memref<16x128xf32, #tpu.memory_space<vmem>>, %arg16: memref<8x16xf32, #tpu.memory_space<vmem>>, %arg17: memref<16x8xf32, #tpu.memory_space<vmem>>, %arg18: memref<8x16xf32, #tpu.memory_space<vmem>>, %arg19: memref<16x8xf32, #tpu.memory_space<vmem>>) attributes {dimension_semantics = [#tpu.dimension_semantics<arbitrary>, #tpu.dimension_semantics<arbitrary>], iteration_bounds = array<i64: 2, 1>, scalar_prefetch = 0 : i64, scratch_operands = 7 : i64, tpu.core_type = #tpu.core_type<tc>, window_params = [{pipeline_mode = #tpu.pipeline_mode<synchronous>, transform_indices = @transform_0, window_bounds = array<i64: 16, 16>}, {pipeline_mode = #tpu.pipeline_mode<synchronous>, transform_indices = @transform_1, window_bounds = array<i64: 16, 64>}, {pipeline_mode = #tpu.pipeline_mode<synchronous>, transform_indices = @transform_2, window_bounds = array<i64: 8, 64>}, {pipeline_mode = #tpu.pipeline_mode<synchronous>, transform_indices = @transform_3, window_bounds = array<i64: 64, 8>}, {pipeline_mode = #tpu.pipeline_mode<synchronous>, transform_indices = @transform_4, window_bounds = array<i64: 1, 64>}, {pipeline_mode = #tpu.pipeline_mode<synchronous>, transform_indices = @transform_5, window_bounds = array<i64: 64, 128>}, {pipeline_mode = #tpu.pipeline_mode<synchronous>, transform_indices = @transform_6, window_bounds = array<i64: 8, 128>}, {pipeline_mode = #tpu.pipeline_mode<synchronous>, transform_indices = @transform_7, window_bounds = array<i64: 128, 8>}, {pipeline_mode = #tpu.pipeline_mode<synchronous>, transform_indices = @transform_8, window_bounds = array<i64: 1, 128>}, {transform_indices = @transform_9, window_bounds = array<i64: 16, 16>}, {transform_indices = @transform_10, window_bounds = array<i64: 16, 128>}]} {
    %c16_i32 = arith.constant 16 : i32
    %0 = arith.muli %arg1, %c16_i32 : i32
    %1 = tpu.assume_multiple %0, 16 : i32
    %c0 = arith.constant 0 : index
    %c0_0 = arith.constant 0 : index
    %2 = vector.load %arg11[%c0, %c0_0] : memref<16x16xi8, #tpu.memory_space<vmem>>, vector<16x16xi8>
    %3 = arith.sitofp %2 : vector<16x16xi8> to vector<16x16xf32>
    %cst = arith.constant 0.000000e+00 : f32
    %4 = vector.broadcast %cst : f32 to vector<16x16xf32>
    %5 = arith.cmpf ogt, %3, %4 : vector<16x16xf32>
    %c0_i32 = arith.constant 0 : i32
    %6 = arith.cmpi eq, %arg0, %c0_i32 : i32
    %c0_i32_1 = arith.constant 0 : i32
    %7 = arith.cmpi eq, %arg1, %c0_i32_1 : i32
    %8 = arith.andi %6, %7 : i1
    %9 = arith.extui %8 : i1 to i32
    %c0_i32_2 = arith.constant 0 : i32
    %10 = arith.cmpi ne, %9, %c0_i32_2 : i32
    scf.if %10 {
      %c0_13 = arith.constant 0 : index
      %c0_14 = arith.constant 0 : index
      %22 = vector.load %arg2[%c0_13, %c0_14] : memref<16x16xf32, #tpu.memory_space<vmem>>, vector<16x16xf32>
      %c0_15 = arith.constant 0 : index
      %c0_16 = arith.constant 0 : index
      %23 = vector.load %arg3[%c0_15, %c0_16] : memref<16x64xf32, #tpu.memory_space<vmem>>, vector<16x64xf32>
      %cst_17 = arith.constant dense<0.000000e+00> : vector<16x64xf32>
      %24 = tpu.matmul %22, %23, %cst_17 {dimension_numbers = #tpu.dot_dimension_numbers<[1], [0], [0], [1], [0, 0, 1, 1], [], []>} : vector<16x16xf32>, vector<16x64xf32>, vector<16x64xf32> -> vector<16x64xf32>
      %c0_18 = arith.constant 0 : index
      %c0_19 = arith.constant 0 : index
      %25 = vector.load %arg13[%c0_18, %c0_19] : memref<16x64xf32, #tpu.memory_space<vmem>>, vector<16x64xf32>
      tpu.vector_store %arg13[%c0_18, %c0_19], %24 {strides = array<i32>} : memref<16x64xf32, #tpu.memory_space<vmem>>, vector<16x64xf32>,
      %c0_20 = arith.constant 0 : index
      %c0_21 = arith.constant 0 : index
      %26 = vector.load %arg4[%c0_20, %c0_21] : memref<8x64xf32, #tpu.memory_space<vmem>>, vector<8x64xf32>
      "tpu.trace_start"() <{level = 10 : i32, message = "hd,nd->hn"}> : () -> ()
      %cst_22 = arith.constant dense<0.000000e+00> : vector<8x16xf32>
      %27 = tpu.matmul %26, %24, %cst_22 {dimension_numbers = #tpu.dot_dimension_numbers<[1], [1], [0], [0], [0, 0, 1, 0], [], []>} : vector<8x64xf32>, vector<16x64xf32>, vector<8x16xf32> -> vector<8x16xf32>
      "tpu.trace_stop"() : () -> ()
      %c0_23 = arith.constant 0 : index
      %c0_24 = arith.constant 0 : index
      %28 = vector.load %arg16[%c0_23, %c0_24] : memref<8x16xf32, #tpu.memory_space<vmem>>, vector<8x16xf32>
      tpu.vector_store %arg16[%c0_23, %c0_24], %27 {strides = array<i32>} : memref<8x16xf32, #tpu.memory_space<vmem>>, vector<8x16xf32>,
      %c0_25 = arith.constant 0 : index
      %c0_26 = arith.constant 0 : index
      %29 = vector.load %arg5[%c0_25, %c0_26] : memref<64x8xf32, #tpu.memory_space<vmem>>, vector<64x8xf32>
      %cst_27 = arith.constant dense<0.000000e+00> : vector<16x8xf32>
      %30 = tpu.matmul %24, %29, %cst_27 {dimension_numbers = #tpu.dot_dimension_numbers<[1], [0], [0], [1], [0, 0, 1, 1], [], []>} : vector<16x64xf32>, vector<64x8xf32>, vector<16x8xf32> -> vector<16x8xf32>
      %c0_28 = arith.constant 0 : index
      %c0_29 = arith.constant 0 : index
      %31 = vector.load %arg17[%c0_28, %c0_29] : memref<16x8xf32, #tpu.memory_space<vmem>>, vector<16x8xf32>
      tpu.vector_store %arg17[%c0_28, %c0_29], %30 {strides = array<i32>} : memref<16x8xf32, #tpu.memory_space<vmem>>, vector<16x8xf32>,
    } else {
    }
    %c0_i32_3 = arith.constant 0 : i32
    %11 = arith.cmpi eq, %arg0, %c0_i32_3 : i32
    %12 = arith.extui %11 : i1 to i32
    %cst_4 = arith.constant 2.000000e-01 : f32
    %cst_5 = arith.constant -1.000000e+30 : f32
    %c0_i32_6 = arith.constant 0 : i32
    %13 = arith.cmpi ne, %12, %c0_i32_6 : i32
    scf.if %13 {
      %c0_13 = arith.constant 0 : index
      %c0_14 = arith.constant 0 : index
      %22 = vector.load %arg13[%c0_13, %c0_14] : memref<16x64xf32, #tpu.memory_space<vmem>>, vector<16x64xf32>
      %23 = arith.index_cast %1 : i32 to index
      %c0_15 = arith.constant 0 : index
      %24 = vector.load %arg17[%23, %c0_15] : memref<16x8xf32, #tpu.memory_space<vmem>>, vector<16x8xf32>
      %25 = vector.extract_strided_slice %24 {offsets = [0, 0], sizes = [16, 1], strides = [1, 1]} : vector<16x8xf32> to vector<16x1xf32>
      %c0_16 = arith.constant 0 : index
      %c0_17 = arith.constant 0 : index
      %26 = vector.load %arg16[%c0_16, %c0_17] : memref<8x16xf32, #tpu.memory_space<vmem>>, vector<1x16xf32>
      %27 = vector.broadcast %25 : vector<16x1xf32> to vector<16x16xf32>
      %28 = vector.broadcast %26 : vector<1x16xf32> to vector<16x16xf32>
      %29 = arith.addf %27, %28 : vector<16x16xf32>
      %cst_18 = arith.constant 0.000000e+00 : f32
      %30 = vector.broadcast %cst_18 : f32 to vector<16x16xf32>
      %31 = arith.cmpf oge, %29, %30 : vector<16x16xf32>
      %32 = vector.broadcast %cst_4 : f32 to vector<16x16xf32>
      %33 = arith.mulf %32, %29 : vector<16x16xf32>
      %34 = arith.select %31, %29, %33 : vector<16x16xi1>, vector<16x16xf32>
      %35 = vector.broadcast %cst_5 : f32 to vector<16x16xf32>
      %36 = arith.select %5, %34, %35 : vector<16x16xi1>, vector<16x16xf32>
      %cst_19 = arith.constant dense<0xFF800000> : vector<16xf32>
      %37 = vector.multi_reduction <maximumf>, %36, %cst_19 [1] : vector<16x16xf32> to vector<16xf32>
      %38 = vector.shape_cast %37 : vector<16xf32> to vector<16x1xf32>
      %39 = vector.broadcast %38 : vector<16x1xf32> to vector<16x16xf32>
      %40 = arith.subf %36, %39 : vector<16x16xf32>
      %41 = math.exp %40 : vector<16x16xf32>
      %cst_20 = arith.constant dense<0.000000e+00> : vector<16xf32>
      %42 = vector.multi_reduction <add>, %41, %cst_20 [1] : vector<16x16xf32> to vector<16xf32>
      %43 = vector.shape_cast %42 : vector<16xf32> to vector<16x1xf32>
      %44 = tpu.reciprocal %43 {approx = true} : vector<16x1xf32> -> vector<16x1xf32>
      %45 = vector.broadcast %44 : vector<16x1xf32> to vector<16x16xf32>
      %46 = arith.mulf %41, %45 : vector<16x16xf32>
      %47 = vector.extract_strided_slice %22 {offsets = [0, 0], sizes = [16, 8], strides = [1, 1]} : vector<16x64xf32> to vector<16x8xf32>
      %cst_21 = arith.constant dense<0.000000e+00> : vector<16x8xf32>
      %48 = tpu.matmul %46, %47, %cst_21 {dimension_numbers = #tpu.dot_dimension_numbers<[1], [0], [0], [1], [0, 0, 1, 1], [], []>} : vector<16x16xf32>, vector<16x8xf32>, vector<16x8xf32> -> vector<16x8xf32>
      %49 = vector.extract_strided_slice %24 {offsets = [0, 1], sizes = [16, 1], strides = [1, 1]} : vector<16x8xf32> to vector<16x1xf32>
      %c1 = arith.constant 1 : index
      %c0_22 = arith.constant 0 : index
      %50 = vector.load %arg16[%c1, %c0_22] : memref<8x16xf32, #tpu.memory_space<vmem>>, vector<1x16xf32>
      %51 = vector.broadcast %49 : vector<16x1xf32> to vector<16x16xf32>
      %52 = vector.broadcast %50 : vector<1x16xf32> to vector<16x16xf32>
      %53 = arith.addf %51, %52 : vector<16x16xf32>
      %cst_23 = arith.constant 0.000000e+00 : f32
      %54 = vector.broadcast %cst_23 : f32 to vector<16x16xf32>
      %55 = arith.cmpf oge, %53, %54 : vector<16x16xf32>
      %56 = vector.broadcast %cst_4 : f32 to vector<16x16xf32>
      %57 = arith.mulf %56, %53 : vector<16x16xf32>
      %58 = arith.select %55, %53, %57 : vector<16x16xi1>, vector<16x16xf32>
      %59 = vector.broadcast %cst_5 : f32 to vector<16x16xf32>
      %60 = arith.select %5, %58, %59 : vector<16x16xi1>, vector<16x16xf32>
      %cst_24 = arith.constant dense<0xFF800000> : vector<16xf32>
      %61 = vector.multi_reduction <maximumf>, %60, %cst_24 [1] : vector<16x16xf32> to vector<16xf32>
      %62 = vector.shape_cast %61 : vector<16xf32> to vector<16x1xf32>
      %63 = vector.broadcast %62 : vector<16x1xf32> to vector<16x16xf32>
      %64 = arith.subf %60, %63 : vector<16x16xf32>
      %65 = math.exp %64 : vector<16x16xf32>
      %cst_25 = arith.constant dense<0.000000e+00> : vector<16xf32>
      %66 = vector.multi_reduction <add>, %65, %cst_25 [1] : vector<16x16xf32> to vector<16xf32>
      %67 = vector.shape_cast %66 : vector<16xf32> to vector<16x1xf32>
      %68 = tpu.reciprocal %67 {approx = true} : vector<16x1xf32> -> vector<16x1xf32>
      %69 = vector.broadcast %68 : vector<16x1xf32> to vector<16x16xf32>
      %70 = arith.mulf %65, %69 : vector<16x16xf32>
      %71 = vector.extract_strided_slice %22 {offsets = [0, 8], sizes = [16, 8], strides = [1, 1]} : vector<16x64xf32> to vector<16x8xf32>
      %cst_26 = arith.constant dense<0.000000e+00> : vector<16x8xf32>
      %72 = tpu.matmul %70, %71, %cst_26 {dimension_numbers = #tpu.dot_dimension_numbers<[1], [0], [0], [1], [0, 0, 1, 1], [], []>} : vector<16x16xf32>, vector<16x8xf32>, vector<16x8xf32> -> vector<16x8xf32>
      %73 = vector.extract_strided_slice %24 {offsets = [0, 2], sizes = [16, 1], strides = [1, 1]} : vector<16x8xf32> to vector<16x1xf32>
      %c2 = arith.constant 2 : index
      %c0_27 = arith.constant 0 : index
      %74 = vector.load %arg16[%c2, %c0_27] : memref<8x16xf32, #tpu.memory_space<vmem>>, vector<1x16xf32>
      %75 = vector.broadcast %73 : vector<16x1xf32> to vector<16x16xf32>
      %76 = vector.broadcast %74 : vector<1x16xf32> to vector<16x16xf32>
      %77 = arith.addf %75, %76 : vector<16x16xf32>
      %cst_28 = arith.constant 0.000000e+00 : f32
      %78 = vector.broadcast %cst_28 : f32 to vector<16x16xf32>
      %79 = arith.cmpf oge, %77, %78 : vector<16x16xf32>
      %80 = vector.broadcast %cst_4 : f32 to vector<16x16xf32>
      %81 = arith.mulf %80, %77 : vector<16x16xf32>
      %82 = arith.select %79, %77, %81 : vector<16x16xi1>, vector<16x16xf32>
      %83 = vector.broadcast %cst_5 : f32 to vector<16x16xf32>
      %84 = arith.select %5, %82, %83 : vector<16x16xi1>, vector<16x16xf32>
      %cst_29 = arith.constant dense<0xFF800000> : vector<16xf32>
      %85 = vector.multi_reduction <maximumf>, %84, %cst_29 [1] : vector<16x16xf32> to vector<16xf32>
      %86 = vector.shape_cast %85 : vector<16xf32> to vector<16x1xf32>
      %87 = vector.broadcast %86 : vector<16x1xf32> to vector<16x16xf32>
      %88 = arith.subf %84, %87 : vector<16x16xf32>
      %89 = math.exp %88 : vector<16x16xf32>
      %cst_30 = arith.constant dense<0.000000e+00> : vector<16xf32>
      %90 = vector.multi_reduction <add>, %89, %cst_30 [1] : vector<16x16xf32> to vector<16xf32>
      %91 = vector.shape_cast %90 : vector<16xf32> to vector<16x1xf32>
      %92 = tpu.reciprocal %91 {approx = true} : vector<16x1xf32> -> vector<16x1xf32>
      %93 = vector.broadcast %92 : vector<16x1xf32> to vector<16x16xf32>
      %94 = arith.mulf %89, %93 : vector<16x16xf32>
      %95 = vector.extract_strided_slice %22 {offsets = [0, 16], sizes = [16, 8], strides = [1, 1]} : vector<16x64xf32> to vector<16x8xf32>
      %cst_31 = arith.constant dense<0.000000e+00> : vector<16x8xf32>
      %96 = tpu.matmul %94, %95, %cst_31 {dimension_numbers = #tpu.dot_dimension_numbers<[1], [0], [0], [1], [0, 0, 1, 1], [], []>} : vector<16x16xf32>, vector<16x8xf32>, vector<16x8xf32> -> vector<16x8xf32>
      %97 = vector.extract_strided_slice %24 {offsets = [0, 3], sizes = [16, 1], strides = [1, 1]} : vector<16x8xf32> to vector<16x1xf32>
      %c3 = arith.constant 3 : index
      %c0_32 = arith.constant 0 : index
      %98 = vector.load %arg16[%c3, %c0_32] : memref<8x16xf32, #tpu.memory_space<vmem>>, vector<1x16xf32>
      %99 = vector.broadcast %97 : vector<16x1xf32> to vector<16x16xf32>
      %100 = vector.broadcast %98 : vector<1x16xf32> to vector<16x16xf32>
      %101 = arith.addf %99, %100 : vector<16x16xf32>
      %cst_33 = arith.constant 0.000000e+00 : f32
      %102 = vector.broadcast %cst_33 : f32 to vector<16x16xf32>
      %103 = arith.cmpf oge, %101, %102 : vector<16x16xf32>
      %104 = vector.broadcast %cst_4 : f32 to vector<16x16xf32>
      %105 = arith.mulf %104, %101 : vector<16x16xf32>
      %106 = arith.select %103, %101, %105 : vector<16x16xi1>, vector<16x16xf32>
      %107 = vector.broadcast %cst_5 : f32 to vector<16x16xf32>
      %108 = arith.select %5, %106, %107 : vector<16x16xi1>, vector<16x16xf32>
      %cst_34 = arith.constant dense<0xFF800000> : vector<16xf32>
      %109 = vector.multi_reduction <maximumf>, %108, %cst_34 [1] : vector<16x16xf32> to vector<16xf32>
      %110 = vector.shape_cast %109 : vector<16xf32> to vector<16x1xf32>
      %111 = vector.broadcast %110 : vector<16x1xf32> to vector<16x16xf32>
      %112 = arith.subf %108, %111 : vector<16x16xf32>
      %113 = math.exp %112 : vector<16x16xf32>
      %cst_35 = arith.constant dense<0.000000e+00> : vector<16xf32>
      %114 = vector.multi_reduction <add>, %113, %cst_35 [1] : vector<16x16xf32> to vector<16xf32>
      %115 = vector.shape_cast %114 : vector<16xf32> to vector<16x1xf32>
      %116 = tpu.reciprocal %115 {approx = true} : vector<16x1xf32> -> vector<16x1xf32>
      %117 = vector.broadcast %116 : vector<16x1xf32> to vector<16x16xf32>
      %118 = arith.mulf %113, %117 : vector<16x16xf32>
      %119 = vector.extract_strided_slice %22 {offsets = [0, 24], sizes = [16, 8], strides = [1, 1]} : vector<16x64xf32> to vector<16x8xf32>
      %cst_36 = arith.constant dense<0.000000e+00> : vector<16x8xf32>
      %120 = tpu.matmul %118, %119, %cst_36 {dimension_numbers = #tpu.dot_dimension_numbers<[1], [0], [0], [1], [0, 0, 1, 1], [], []>} : vector<16x16xf32>, vector<16x8xf32>, vector<16x8xf32> -> vector<16x8xf32>
      %121 = vector.extract_strided_slice %24 {offsets = [0, 4], sizes = [16, 1], strides = [1, 1]} : vector<16x8xf32> to vector<16x1xf32>
      %c4 = arith.constant 4 : index
      %c0_37 = arith.constant 0 : index
      %122 = vector.load %arg16[%c4, %c0_37] : memref<8x16xf32, #tpu.memory_space<vmem>>, vector<1x16xf32>
      %123 = vector.broadcast %121 : vector<16x1xf32> to vector<16x16xf32>
      %124 = vector.broadcast %122 : vector<1x16xf32> to vector<16x16xf32>
      %125 = arith.addf %123, %124 : vector<16x16xf32>
      %cst_38 = arith.constant 0.000000e+00 : f32
      %126 = vector.broadcast %cst_38 : f32 to vector<16x16xf32>
      %127 = arith.cmpf oge, %125, %126 : vector<16x16xf32>
      %128 = vector.broadcast %cst_4 : f32 to vector<16x16xf32>
      %129 = arith.mulf %128, %125 : vector<16x16xf32>
      %130 = arith.select %127, %125, %129 : vector<16x16xi1>, vector<16x16xf32>
      %131 = vector.broadcast %cst_5 : f32 to vector<16x16xf32>
      %132 = arith.select %5, %130, %131 : vector<16x16xi1>, vector<16x16xf32>
      %cst_39 = arith.constant dense<0xFF800000> : vector<16xf32>
      %133 = vector.multi_reduction <maximumf>, %132, %cst_39 [1] : vector<16x16xf32> to vector<16xf32>
      %134 = vector.shape_cast %133 : vector<16xf32> to vector<16x1xf32>
      %135 = vector.broadcast %134 : vector<16x1xf32> to vector<16x16xf32>
      %136 = arith.subf %132, %135 : vector<16x16xf32>
      %137 = math.exp %136 : vector<16x16xf32>
      %cst_40 = arith.constant dense<0.000000e+00> : vector<16xf32>
      %138 = vector.multi_reduction <add>, %137, %cst_40 [1] : vector<16x16xf32> to vector<16xf32>
      %139 = vector.shape_cast %138 : vector<16xf32> to vector<16x1xf32>
      %140 = tpu.reciprocal %139 {approx = true} : vector<16x1xf32> -> vector<16x1xf32>
      %141 = vector.broadcast %140 : vector<16x1xf32> to vector<16x16xf32>
      %142 = arith.mulf %137, %141 : vector<16x16xf32>
      %143 = vector.extract_strided_slice %22 {offsets = [0, 32], sizes = [16, 8], strides = [1, 1]} : vector<16x64xf32> to vector<16x8xf32>
      %cst_41 = arith.constant dense<0.000000e+00> : vector<16x8xf32>
      %144 = tpu.matmul %142, %143, %cst_41 {dimension_numbers = #tpu.dot_dimension_numbers<[1], [0], [0], [1], [0, 0, 1, 1], [], []>} : vector<16x16xf32>, vector<16x8xf32>, vector<16x8xf32> -> vector<16x8xf32>
      %145 = vector.extract_strided_slice %24 {offsets = [0, 5], sizes = [16, 1], strides = [1, 1]} : vector<16x8xf32> to vector<16x1xf32>
      %c5 = arith.constant 5 : index
      %c0_42 = arith.constant 0 : index
      %146 = vector.load %arg16[%c5, %c0_42] : memref<8x16xf32, #tpu.memory_space<vmem>>, vector<1x16xf32>
      %147 = vector.broadcast %145 : vector<16x1xf32> to vector<16x16xf32>
      %148 = vector.broadcast %146 : vector<1x16xf32> to vector<16x16xf32>
      %149 = arith.addf %147, %148 : vector<16x16xf32>
      %cst_43 = arith.constant 0.000000e+00 : f32
      %150 = vector.broadcast %cst_43 : f32 to vector<16x16xf32>
      %151 = arith.cmpf oge, %149, %150 : vector<16x16xf32>
      %152 = vector.broadcast %cst_4 : f32 to vector<16x16xf32>
      %153 = arith.mulf %152, %149 : vector<16x16xf32>
      %154 = arith.select %151, %149, %153 : vector<16x16xi1>, vector<16x16xf32>
      %155 = vector.broadcast %cst_5 : f32 to vector<16x16xf32>
      %156 = arith.select %5, %154, %155 : vector<16x16xi1>, vector<16x16xf32>
      %cst_44 = arith.constant dense<0xFF800000> : vector<16xf32>
      %157 = vector.multi_reduction <maximumf>, %156, %cst_44 [1] : vector<16x16xf32> to vector<16xf32>
      %158 = vector.shape_cast %157 : vector<16xf32> to vector<16x1xf32>
      %159 = vector.broadcast %158 : vector<16x1xf32> to vector<16x16xf32>
      %160 = arith.subf %156, %159 : vector<16x16xf32>
      %161 = math.exp %160 : vector<16x16xf32>
      %cst_45 = arith.constant dense<0.000000e+00> : vector<16xf32>
      %162 = vector.multi_reduction <add>, %161, %cst_45 [1] : vector<16x16xf32> to vector<16xf32>
      %163 = vector.shape_cast %162 : vector<16xf32> to vector<16x1xf32>
      %164 = tpu.reciprocal %163 {approx = true} : vector<16x1xf32> -> vector<16x1xf32>
      %165 = vector.broadcast %164 : vector<16x1xf32> to vector<16x16xf32>
      %166 = arith.mulf %161, %165 : vector<16x16xf32>
      %167 = vector.extract_strided_slice %22 {offsets = [0, 40], sizes = [16, 8], strides = [1, 1]} : vector<16x64xf32> to vector<16x8xf32>
      %cst_46 = arith.constant dense<0.000000e+00> : vector<16x8xf32>
      %168 = tpu.matmul %166, %167, %cst_46 {dimension_numbers = #tpu.dot_dimension_numbers<[1], [0], [0], [1], [0, 0, 1, 1], [], []>} : vector<16x16xf32>, vector<16x8xf32>, vector<16x8xf32> -> vector<16x8xf32>
      %169 = vector.extract_strided_slice %24 {offsets = [0, 6], sizes = [16, 1], strides = [1, 1]} : vector<16x8xf32> to vector<16x1xf32>
      %c6 = arith.constant 6 : index
      %c0_47 = arith.constant 0 : index
      %170 = vector.load %arg16[%c6, %c0_47] : memref<8x16xf32, #tpu.memory_space<vmem>>, vector<1x16xf32>
      %171 = vector.broadcast %169 : vector<16x1xf32> to vector<16x16xf32>
      %172 = vector.broadcast %170 : vector<1x16xf32> to vector<16x16xf32>
      %173 = arith.addf %171, %172 : vector<16x16xf32>
      %cst_48 = arith.constant 0.000000e+00 : f32
      %174 = vector.broadcast %cst_48 : f32 to vector<16x16xf32>
      %175 = arith.cmpf oge, %173, %174 : vector<16x16xf32>
      %176 = vector.broadcast %cst_4 : f32 to vector<16x16xf32>
      %177 = arith.mulf %176, %173 : vector<16x16xf32>
      %178 = arith.select %175, %173, %177 : vector<16x16xi1>, vector<16x16xf32>
      %179 = vector.broadcast %cst_5 : f32 to vector<16x16xf32>
      %180 = arith.select %5, %178, %179 : vector<16x16xi1>, vector<16x16xf32>
      %cst_49 = arith.constant dense<0xFF800000> : vector<16xf32>
      %181 = vector.multi_reduction <maximumf>, %180, %cst_49 [1] : vector<16x16xf32> to vector<16xf32>
      %182 = vector.shape_cast %181 : vector<16xf32> to vector<16x1xf32>
      %183 = vector.broadcast %182 : vector<16x1xf32> to vector<16x16xf32>
      %184 = arith.subf %180, %183 : vector<16x16xf32>
      %185 = math.exp %184 : vector<16x16xf32>
      %cst_50 = arith.constant dense<0.000000e+00> : vector<16xf32>
      %186 = vector.multi_reduction <add>, %185, %cst_50 [1] : vector<16x16xf32> to vector<16xf32>
      %187 = vector.shape_cast %186 : vector<16xf32> to vector<16x1xf32>
      %188 = tpu.reciprocal %187 {approx = true} : vector<16x1xf32> -> vector<16x1xf32>
      %189 = vector.broadcast %188 : vector<16x1xf32> to vector<16x16xf32>
      %190 = arith.mulf %185, %189 : vector<16x16xf32>
      %191 = vector.extract_strided_slice %22 {offsets = [0, 48], sizes = [16, 8], strides = [1, 1]} : vector<16x64xf32> to vector<16x8xf32>
      %cst_51 = arith.constant dense<0.000000e+00> : vector<16x8xf32>
      %192 = tpu.matmul %190, %191, %cst_51 {dimension_numbers = #tpu.dot_dimension_numbers<[1], [0], [0], [1], [0, 0, 1, 1], [], []>} : vector<16x16xf32>, vector<16x8xf32>, vector<16x8xf32> -> vector<16x8xf32>
      %193 = vector.extract_strided_slice %24 {offsets = [0, 7], sizes = [16, 1], strides = [1, 1]} : vector<16x8xf32> to vector<16x1xf32>
      %c7 = arith.constant 7 : index
      %c0_52 = arith.constant 0 : index
      %194 = vector.load %arg16[%c7, %c0_52] : memref<8x16xf32, #tpu.memory_space<vmem>>, vector<1x16xf32>
      %195 = vector.broadcast %193 : vector<16x1xf32> to vector<16x16xf32>
      %196 = vector.broadcast %194 : vector<1x16xf32> to vector<16x16xf32>
      %197 = arith.addf %195, %196 : vector<16x16xf32>
      %cst_53 = arith.constant 0.000000e+00 : f32
      %198 = vector.broadcast %cst_53 : f32 to vector<16x16xf32>
      %199 = arith.cmpf oge, %197, %198 : vector<16x16xf32>
      %200 = vector.broadcast %cst_4 : f32 to vector<16x16xf32>
      %201 = arith.mulf %200, %197 : vector<16x16xf32>
      %202 = arith.select %199, %197, %201 : vector<16x16xi1>, vector<16x16xf32>
      %203 = vector.broadcast %cst_5 : f32 to vector<16x16xf32>
      %204 = arith.select %5, %202, %203 : vector<16x16xi1>, vector<16x16xf32>
      %cst_54 = arith.constant dense<0xFF800000> : vector<16xf32>
      %205 = vector.multi_reduction <maximumf>, %204, %cst_54 [1] : vector<16x16xf32> to vector<16xf32>
      %206 = vector.shape_cast %205 : vector<16xf32> to vector<16x1xf32>
      %207 = vector.broadcast %206 : vector<16x1xf32> to vector<16x16xf32>
      %208 = arith.subf %204, %207 : vector<16x16xf32>
      %209 = math.exp %208 : vector<16x16xf32>
      %cst_55 = arith.constant dense<0.000000e+00> : vector<16xf32>
      %210 = vector.multi_reduction <add>, %209, %cst_55 [1] : vector<16x16xf32> to vector<16xf32>
      %211 = vector.shape_cast %210 : vector<16xf32> to vector<16x1xf32>
      %212 = tpu.reciprocal %211 {approx = true} : vector<16x1xf32> -> vector<16x1xf32>
      %213 = vector.broadcast %212 : vector<16x1xf32> to vector<16x16xf32>
      %214 = arith.mulf %209, %213 : vector<16x16xf32>
      %215 = vector.extract_strided_slice %22 {offsets = [0, 56], sizes = [16, 8], strides = [1, 1]} : vector<16x64xf32> to vector<16x8xf32>
      %cst_56 = arith.constant dense<0.000000e+00> : vector<16x8xf32>
      %216 = tpu.matmul %214, %215, %cst_56 {dimension_numbers = #tpu.dot_dimension_numbers<[1], [0], [0], [1], [0, 0, 1, 1], [], []>} : vector<16x16xf32>, vector<16x8xf32>, vector<16x8xf32> -> vector<16x8xf32>
      %217 = tpu.concatenate %48, %72, %96, %120, %144, %168, %192, %216 in 1 : vector<16x8xf32>, vector<16x8xf32>, vector<16x8xf32>, vector<16x8xf32>, vector<16x8xf32>, vector<16x8xf32>, vector<16x8xf32>, vector<16x8xf32> -> vector<16x64xf32>
      %c0_57 = arith.constant 0 : index
      %c0_58 = arith.constant 0 : index
      %218 = vector.load %arg6[%c0_57, %c0_58] : memref<1x64xf32, #tpu.memory_space<vmem>>, vector<1x64xf32>
      %219 = vector.broadcast %218 : vector<1x64xf32> to vector<16x64xf32>
      %220 = arith.addf %217, %219 : vector<16x64xf32>
      %cst_59 = arith.constant 0.000000e+00 : f32
      %221 = vector.broadcast %cst_59 : f32 to vector<16x64xf32>
      %222 = arith.maximumf %220, %221 : vector<16x64xf32>
      %223 = arith.index_cast %1 : i32 to index
      %c0_60 = arith.constant 0 : index
      %224 = vector.load %arg14[%223, %c0_60] : memref<16x64xf32, #tpu.memory_space<vmem>>, vector<16x64xf32>
      tpu.vector_store %arg14[%223, %c0_60], %222 {strides = array<i32>} : memref<16x64xf32, #tpu.memory_space<vmem>>, vector<16x64xf32>,
    } else {
    }
    %c1_i32 = arith.constant 1 : i32
    %14 = arith.cmpi eq, %arg0, %c1_i32 : i32
    %c0_i32_7 = arith.constant 0 : i32
    %15 = arith.cmpi eq, %arg1, %c0_i32_7 : i32
    %16 = arith.andi %14, %15 : i1
    %17 = arith.extui %16 : i1 to i32
    %c0_i32_8 = arith.constant 0 : i32
    %18 = arith.cmpi ne, %17, %c0_i32_8 : i32
    scf.if %18 {
      %c0_13 = arith.constant 0 : index
      %c0_14 = arith.constant 0 : index
      %22 = vector.load %arg14[%c0_13, %c0_14] : memref<16x64xf32, #tpu.memory_space<vmem>>, vector<16x64xf32>
      %c0_15 = arith.constant 0 : index
      %c0_16 = arith.constant 0 : index
      %23 = vector.load %arg7[%c0_15, %c0_16] : memref<64x128xf32, #tpu.memory_space<vmem>>, vector<64x128xf32>
      %cst_17 = arith.constant dense<0.000000e+00> : vector<16x128xf32>
      %24 = tpu.matmul %22, %23, %cst_17 {dimension_numbers = #tpu.dot_dimension_numbers<[1], [0], [0], [1], [0, 0, 1, 1], [], []>} : vector<16x64xf32>, vector<64x128xf32>, vector<16x128xf32> -> vector<16x128xf32>
      %c0_18 = arith.constant 0 : index
      %c0_19 = arith.constant 0 : index
      %25 = vector.load %arg15[%c0_18, %c0_19] : memref<16x128xf32, #tpu.memory_space<vmem>>, vector<16x128xf32>
      tpu.vector_store %arg15[%c0_18, %c0_19], %24 {strides = array<i32>} : memref<16x128xf32, #tpu.memory_space<vmem>>, vector<16x128xf32>,
      %c0_20 = arith.constant 0 : index
      %c0_21 = arith.constant 0 : index
      %26 = vector.load %arg8[%c0_20, %c0_21] : memref<8x128xf32, #tpu.memory_space<vmem>>, vector<8x128xf32>
      "tpu.trace_start"() <{level = 10 : i32, message = "hd,nd->hn"}> : () -> ()
      %cst_22 = arith.constant dense<0.000000e+00> : vector<8x16xf32>
      %27 = tpu.matmul %26, %24, %cst_22 {dimension_numbers = #tpu.dot_dimension_numbers<[1], [1], [0], [0], [0, 0, 1, 0], [], []>} : vector<8x128xf32>, vector<16x128xf32>, vector<8x16xf32> -> vector<8x16xf32>
      "tpu.trace_stop"() : () -> ()
      %c0_23 = arith.constant 0 : index
      %c0_24 = arith.constant 0 : index
      %28 = vector.load %arg18[%c0_23, %c0_24] : memref<8x16xf32, #tpu.memory_space<vmem>>, vector<8x16xf32>
      tpu.vector_store %arg18[%c0_23, %c0_24], %27 {strides = array<i32>} : memref<8x16xf32, #tpu.memory_space<vmem>>, vector<8x16xf32>,
      %c0_25 = arith.constant 0 : index
      %c0_26 = arith.constant 0 : index
      %29 = vector.load %arg9[%c0_25, %c0_26] : memref<128x8xf32, #tpu.memory_space<vmem>>, vector<128x8xf32>
      %cst_27 = arith.constant dense<0.000000e+00> : vector<16x8xf32>
      %30 = tpu.matmul %24, %29, %cst_27 {dimension_numbers = #tpu.dot_dimension_numbers<[1], [0], [0], [1], [0, 0, 1, 1], [], []>} : vector<16x128xf32>, vector<128x8xf32>, vector<16x8xf32> -> vector<16x8xf32>
      %c0_28 = arith.constant 0 : index
      %c0_29 = arith.constant 0 : index
      %31 = vector.load %arg19[%c0_28, %c0_29] : memref<16x8xf32, #tpu.memory_space<vmem>>, vector<16x8xf32>
      tpu.vector_store %arg19[%c0_28, %c0_29], %30 {strides = array<i32>} : memref<16x8xf32, #tpu.memory_space<vmem>>, vector<16x8xf32>,
    } else {
    }
    %c1_i32_9 = arith.constant 1 : i32
    %19 = arith.cmpi eq, %arg0, %c1_i32_9 : i32
    %20 = arith.extui %19 : i1 to i32
    %cst_10 = arith.constant 2.000000e-01 : f32
    %cst_11 = arith.constant -1.000000e+30 : f32
    %c0_i32_12 = arith.constant 0 : i32
    %21 = arith.cmpi ne, %20, %c0_i32_12 : i32
    scf.if %21 {
      %c0_13 = arith.constant 0 : index
      %c0_14 = arith.constant 0 : index
      %22 = vector.load %arg15[%c0_13, %c0_14] : memref<16x128xf32, #tpu.memory_space<vmem>>, vector<16x128xf32>
      %23 = arith.index_cast %1 : i32 to index
      %c0_15 = arith.constant 0 : index
      %24 = vector.load %arg19[%23, %c0_15] : memref<16x8xf32, #tpu.memory_space<vmem>>, vector<16x8xf32>
      %25 = vector.extract_strided_slice %24 {offsets = [0, 0], sizes = [16, 1], strides = [1, 1]} : vector<16x8xf32> to vector<16x1xf32>
      %c0_16 = arith.constant 0 : index
      %c0_17 = arith.constant 0 : index
      %26 = vector.load %arg18[%c0_16, %c0_17] : memref<8x16xf32, #tpu.memory_space<vmem>>, vector<1x16xf32>
      %27 = vector.broadcast %25 : vector<16x1xf32> to vector<16x16xf32>
      %28 = vector.broadcast %26 : vector<1x16xf32> to vector<16x16xf32>
      %29 = arith.addf %27, %28 : vector<16x16xf32>
      %cst_18 = arith.constant 0.000000e+00 : f32
      %30 = vector.broadcast %cst_18 : f32 to vector<16x16xf32>
      %31 = arith.cmpf oge, %29, %30 : vector<16x16xf32>
      %32 = vector.broadcast %cst_10 : f32 to vector<16x16xf32>
      %33 = arith.mulf %32, %29 : vector<16x16xf32>
      %34 = arith.select %31, %29, %33 : vector<16x16xi1>, vector<16x16xf32>
      %35 = vector.broadcast %cst_11 : f32 to vector<16x16xf32>
      %36 = arith.select %5, %34, %35 : vector<16x16xi1>, vector<16x16xf32>
      %cst_19 = arith.constant dense<0xFF800000> : vector<16xf32>
      %37 = vector.multi_reduction <maximumf>, %36, %cst_19 [1] : vector<16x16xf32> to vector<16xf32>
      %38 = vector.shape_cast %37 : vector<16xf32> to vector<16x1xf32>
      %39 = vector.broadcast %38 : vector<16x1xf32> to vector<16x16xf32>
      %40 = arith.subf %36, %39 : vector<16x16xf32>
      %41 = math.exp %40 : vector<16x16xf32>
      %cst_20 = arith.constant dense<0.000000e+00> : vector<16xf32>
      %42 = vector.multi_reduction <add>, %41, %cst_20 [1] : vector<16x16xf32> to vector<16xf32>
      %43 = vector.shape_cast %42 : vector<16xf32> to vector<16x1xf32>
      %44 = tpu.reciprocal %43 {approx = true} : vector<16x1xf32> -> vector<16x1xf32>
      %45 = vector.broadcast %44 : vector<16x1xf32> to vector<16x16xf32>
      %46 = arith.mulf %41, %45 : vector<16x16xf32>
      %cst_21 = arith.constant dense<0.000000e+00> : vector<16x128xf32>
      %47 = tpu.matmul %46, %22, %cst_21 {dimension_numbers = #tpu.dot_dimension_numbers<[1], [0], [0], [1], [0, 0, 1, 1], [], []>} : vector<16x16xf32>, vector<16x128xf32>, vector<16x128xf32> -> vector<16x128xf32>
      %c0_22 = arith.constant 0 : index
      %c0_23 = arith.constant 0 : index
      %48 = vector.load %arg10[%c0_22, %c0_23] : memref<1x128xf32, #tpu.memory_space<vmem>>, vector<1x128xf32>
      %49 = vector.broadcast %48 : vector<1x128xf32> to vector<16x128xf32>
      %50 = arith.addf %47, %49 : vector<16x128xf32>
      %51 = tpu.iota {dimensions = array<i32: 1>} : vector<16x128xi32>
      %c8_i32 = arith.constant 8 : i32
      %52 = vector.broadcast %c8_i32 : i32 to vector<16x128xi32>
      %53 = arith.cmpi slt, %51, %52 : vector<16x128xi32>
      %54 = vector.broadcast %cst_11 : f32 to vector<16x128xf32>
      %55 = arith.select %53, %50, %54 : vector<16x128xi1>, vector<16x128xf32>
      %cst_24 = arith.constant dense<0xFF800000> : vector<16xf32>
      %56 = vector.multi_reduction <maximumf>, %55, %cst_24 [1] : vector<16x128xf32> to vector<16xf32>
      %57 = vector.shape_cast %56 : vector<16xf32> to vector<16x1xf32>
      %58 = vector.broadcast %57 : vector<16x1xf32> to vector<16x128xf32>
      %59 = arith.subf %55, %58 : vector<16x128xf32>
      %60 = math.exp %59 : vector<16x128xf32>
      %cst_25 = arith.constant dense<0.000000e+00> : vector<16xf32>
      %61 = vector.multi_reduction <add>, %60, %cst_25 [1] : vector<16x128xf32> to vector<16xf32>
      %62 = vector.shape_cast %61 : vector<16xf32> to vector<16x1xf32>
      %63 = math.log %62 : vector<16x1xf32>
      %64 = arith.addf %57, %63 : vector<16x1xf32>
      %65 = vector.broadcast %64 : vector<16x1xf32> to vector<16x128xf32>
      %66 = arith.subf %50, %65 : vector<16x128xf32>
      %cst_26 = arith.constant 0.000000e+00 : f32
      %67 = vector.broadcast %cst_26 : f32 to vector<16x128xf32>
      %68 = arith.select %53, %66, %67 : vector<16x128xi1>, vector<16x128xf32>
      %c0_27 = arith.constant 0 : index
      %c0_28 = arith.constant 0 : index
      %69 = vector.load %arg12[%c0_27, %c0_28] : memref<16x128xf32, #tpu.memory_space<vmem>>, vector<16x128xf32>
      tpu.vector_store %arg12[%c0_27, %c0_28], %68 {strides = array<i32>} : memref<16x128xf32, #tpu.memory_space<vmem>>, vector<16x128xf32>,
    } else {
    }
    return
  }
  func.func @transform_0(%arg0: i32, %arg1: i32) -> (i32, i32) {
    %c0_i32 = arith.constant 0 : i32
    %c0_i32_0 = arith.constant 0 : i32
    %c0_i32_1 = arith.constant 0 : i32
    return %c0_i32, %c0_i32_0 : i32, i32
  }
  func.func @transform_1(%arg0: i32, %arg1: i32) -> (i32, i32) {
    %c0_i32 = arith.constant 0 : i32
    %c0_i32_0 = arith.constant 0 : i32
    %c0_i32_1 = arith.constant 0 : i32
    return %c0_i32, %c0_i32_0 : i32, i32
  }
  func.func @transform_2(%arg0: i32, %arg1: i32) -> (i32, i32) {
    %c0_i32 = arith.constant 0 : i32
    %c0_i32_0 = arith.constant 0 : i32
    %c0_i32_1 = arith.constant 0 : i32
    return %c0_i32, %c0_i32_0 : i32, i32
  }
  func.func @transform_3(%arg0: i32, %arg1: i32) -> (i32, i32) {
    %c0_i32 = arith.constant 0 : i32
    %c0_i32_0 = arith.constant 0 : i32
    %c0_i32_1 = arith.constant 0 : i32
    return %c0_i32, %c0_i32_0 : i32, i32
  }
  func.func @transform_4(%arg0: i32, %arg1: i32) -> (i32, i32) {
    %c0_i32 = arith.constant 0 : i32
    %c0_i32_0 = arith.constant 0 : i32
    %c0_i32_1 = arith.constant 0 : i32
    return %c0_i32, %c0_i32_0 : i32, i32
  }
  func.func @transform_5(%arg0: i32, %arg1: i32) -> (i32, i32) {
    %c0_i32 = arith.constant 0 : i32
    %c0_i32_0 = arith.constant 0 : i32
    %c0_i32_1 = arith.constant 0 : i32
    return %c0_i32, %c0_i32_0 : i32, i32
  }
  func.func @transform_6(%arg0: i32, %arg1: i32) -> (i32, i32) {
    %c0_i32 = arith.constant 0 : i32
    %c0_i32_0 = arith.constant 0 : i32
    %c0_i32_1 = arith.constant 0 : i32
    return %c0_i32, %c0_i32_0 : i32, i32
  }
  func.func @transform_7(%arg0: i32, %arg1: i32) -> (i32, i32) {
    %c0_i32 = arith.constant 0 : i32
    %c0_i32_0 = arith.constant 0 : i32
    %c0_i32_1 = arith.constant 0 : i32
    return %c0_i32, %c0_i32_0 : i32, i32
  }
  func.func @transform_8(%arg0: i32, %arg1: i32) -> (i32, i32) {
    %c0_i32 = arith.constant 0 : i32
    %c0_i32_0 = arith.constant 0 : i32
    %c0_i32_1 = arith.constant 0 : i32
    return %c0_i32, %c0_i32_0 : i32, i32
  }
  func.func @transform_9(%arg0: i32, %arg1: i32) -> (i32, i32) {
    %c0_i32 = arith.constant 0 : i32
    %c0_i32_0 = arith.constant 0 : i32
    return %arg1, %c0_i32 : i32, i32
  }
  func.func @transform_10(%arg0: i32, %arg1: i32) -> (i32, i32) {
    %0 = arith.muli %arg0, %arg1 : i32
    %c0_i32 = arith.constant 0 : i32
    %c0_i32_0 = arith.constant 0 : i32
    return %0, %c0_i32 : i32, i32
  }
}

</mosaic_0001>

<bundles_post_ra>
// kernel: gat_forward.1
= control target key start
LH: loop header
LB: loop body
LE: loop exit
PB: predicated region body
PF: predicated region fallthrough
CT: control target
= control target key end

     0   :  { %s3022_s13 = smov 0   ;;  %s3024_s14 = smov 0   ;;  %s3436_s0 = inlined_call_operand.vmem [shape: f32[16,16], index: 0, kind: input, shape index: {}]   ;;  %s3437_s1 = inlined_call_operand.vmem [shape: f32[16,64], index: 1, kind: input, shape index: {}]   ;;  %s3438_s2 = inlined_call_operand.vmem [shape: f32[8,64], index: 2, kind: input, shape index: {}]   ;;  %s3439_s3 = inlined_call_operand.vmem [shape: f32[64,8], index: 3, kind: input, shape index: {}]   ;;  %s3440_s4 = inlined_call_operand.vmem [shape: f32[1,64], index: 4, kind: input, shape index: {}]   ;;  %s3441_s5 = inlined_call_operand.vmem [shape: f32[64,128], index: 5, kind: input, shape index: {}]   ;;  %s3442_s6 = inlined_call_operand.vmem [shape: f32[8,128], index: 6, kind: input, shape index: {}]   ;;  %s3443_s7 = inlined_call_operand.vmem [shape: f32[128,8], index: 7, kind: input, shape index: {}]   ;;  %s3444_s8 = inlined_call_operand.vmem [shape: f32[1,128], index: 8, kind: input, shape index: {}]   ;;  %s3445_s9 = inlined_call_operand.vmem [shape: s8[16,16], index: 9, kind: input, shape index: {}]   ;;  %s3446_s10 = inlined_call_operand.vmem [shape: f32[16,128], index: 10, kind: output, shape index: {}]  }
   0x1   :  { %s3026_s15 = smov 0  }
   0x2 LB: > { %s32_s16 = sadd.s32 1, %s2932_s14  ;;  %p2327_p0 = scmp.ge.s32.totalorder %s2936_s15, 1  ;;  %s2936_s15 = sphi %s3026_s15, %s20_s15   ;;  %s2932_s14 = sphi %s3024_s14, %s3448_s14   ;;  %s2928_s13 = sphi %s3022_s13, %s3447_s13  }
   0x3   : > { %p34_p1 = scmp.ge.s32.totalorder %s32_s16, 2  ;;  %p327_p2 = scmp.lt.s32.totalorder %s2936_s15, 3 }
   0x5   : > { %s3450_s16 = smov (%p34_p1, %s32_s16), 0  ;;  %p328_p3 = pnand %p2327_p0, %p327_p2 }
   0x6   : > { %v2377_v0 = vld [vmem:[%s3445_s9] sm:$0xf] (!%p328_p3)   ;;  %p389_p4 = scmp.eq.s32.totalorder (!%p328_p3), %s2928_s13, 0 }
   0x7   : > { %331 = sbr.rel (%p328_p3) target bundleno = 2731 (0xaab), region = 60  ;;  %v2378_v1 = vunpack.c.0.s8 (!%p328_p3), %v2377_v0  ;;  %v2379_v2 = vunpack.c.1.s8 (!%p328_p3), %v2377_v0 }
   0x9   : > { %v3046_v3 = vcvt.s32.f32 (!%p328_p3), %v2378_v1  ;;  %v3048_v4 = vcvt.s32.f32 (!%p328_p3), %v2379_v2 }
   0xb   : > { %vm387_vm0 = vcmp.gt.f32.partialorder (!%p328_p3), %v3046_v3, 0.0  ;;  %vm388_vm1 = vcmp.gt.f32.partialorder (!%p328_p3), %v3048_v4, 0.0 }
   0xe   : > { %394 = sbr.rel (!%p389_p4) target bundleno = 456 (0x1c8), region = 64  ;;  %v397_v5 = vld [vmem:[%s3437_s1] sm:$0xff] (%p389_p4)  ;;  %v398_v6 = vld [vmem:[%s3437_s1 + $0x8] sm:$0xff] (%p389_p4)  ;;  %vm399_vm2 = vcmask (%p389_p4), 130048   ;;  %v567_v12 = vld [vmem:[%s3439_s3 + $0x10] sm:$0xff] (%p389_p4)  ;;  %v2938_v22 = vmov (%p389_p4), 0.0|0.0  }
   0xf   : > { %v395_v7 = vld [vmem:[%s3436_s0] sm:$0xff] (%p389_p4)  ;;  %v2621_v8 = vpack.c.bf16 (%p389_p4), %v398_v6, %v397_v5  ;;  %v566_v10 = vld [vmem:[%s3439_s3 + $0x8] sm:$0xff] (%p389_p4)  ;;  %v568_v13 = vld [vmem:[%s3439_s3 + $0x18] sm:$0xff] (%p389_p4)  ;;  %vm2939_vm3 = vmmov (%p389_p4), 0   ;;  %v2940_v23 = vmov (%p389_p4), 0.0   ;;  %vm481_vm4 = vcmask (%p389_p4), 523264  }
  0x10   : > { %2468 = vmatprep.mubr.msk.f32.mxu1 (%p389_p4), %vm399_vm2, %v395_v7  ;;  %v565_v9 = vld [vmem:[%s3439_s3] sm:$0xff] (%p389_p4)  ;;  %v2633_v14 = vpack.c.bf16 (%p389_p4), %v568_v13, %v567_v12  ;;  %v570_v16 = vld [vmem:[%s3439_s3 + $0x28] sm:$0xff] (%p389_p4)  ;;  %v571_v19 = vld [vmem:[%s3439_s3 + $0x30] sm:$0xff] (%p389_p4)  ;;  %vm648_vm6 = vcmask (%p389_p4), 64512  }
  0x11   : > { %v2629_v11 = vpack.c.bf16 (%p389_p4), %v566_v10, %v565_v9  ;;  %2622 = vmatprep.subr.bf16.mxu1 (%p389_p4), %v2621_v8  ;;  %v569_v15 = vld [vmem:[%s3439_s3 + $0x20] sm:$0xff] (%p389_p4)  ;;  %v396_v17 = vld [vmem:[%s3436_s0 + $0x8] sm:$0xff] (%p389_p4)  ;;  %v572_v20 = vld [vmem:[%s3439_s3 + $0x38] sm:$0xff] (%p389_p4) }
  0x12   : > { %2624 = vmatpush3.bf16.msra.mxu1 (%p389_p4), %v2621_v8  ;;  %v2637_v18 = vpack.c.bf16 (%p389_p4), %v570_v16, %v569_v15  ;;  %v2641_v21 = vpack.c.bf16 (%p389_p4), %v572_v20, %v571_v19  ;;  %vm2627_vm5 = vmpackc.low (%p389_p4), %vm481_vm4, %vm481_vm4  ;;  %v484_v27 = vld [vmem:[%s3438_s2] sm:$0xff] (%p389_p4) }
  0x13   : > { %2630 = vmatprep.subr.bf16.mxu0 (%p389_p4), %v2629_v11  ;;  %2625 = vmatprep.subr.bf16.mxu1 (%p389_p4), %v2938_v22 }
  0x14   : > { %2632 = vmatpush3.bf16.msra.mxu0 (%p389_p4), %v2629_v11 }
  0x15   : > { %2634 = vmatprep.subr.bf16.mxu0 %v2633_v14  ;;  %2469 = vmatmul.mubr.msk.f32.vlgmr.msra.gmra.mrb[0].mxu1 %vm399_vm2, %v396_v17 }
  0x16   : > { %2475 = vmatprep.mubr.msk.f32.mxu1 %vm2939_vm3, %v2940_v23 }
  0x18   : > { %2636 = vmatpush3.bf16.msra.mxu0 %v2633_v14 }
  0x19   : > { %2638 = vmatprep.subr.bf16.mxu0 %v2637_v18 }
  0x1c   : > { %2640 = vmatpush3.bf16.msra.mxu0 %v2637_v18 }
  0x1d   : > { %2642 = vmatprep.subr.bf16.mxu0 %v2641_v21 }
  0x20   : > { %2644 = vmatpush3.bf16.msra.mxu0 %v2641_v21 }
  0xe8   : > { %v2470_v24 = vpop.f32.mrb[0].mxu1 }
  0xe9   : > { %483 = vst.msk [vmem:[#allocation2 + $0x8] sm:$0xff] %vm481_vm4, %v2470_v24  ;;  %v472_v25 = vpop.f32.mrb[1].mxu1 }
  0xea   : > { %482 = vst.msk [vmem:[#allocation2] sm:$0xff] %vm481_vm4, %v472_v25  ;;  %v2626_v26 = vpack.c.bf16 %v2470_v24, %v472_v25  ;;  %2494 = vmatprep.mubr.msk.f32.mxu0 %vm481_vm4, %v472_v25 }
  0xeb   : > { %2495 = vmatmul.mubr.msk.f32.vlgmr.msra.gmra.mrb[0].mxu0 %vm481_vm4, %v2470_v24 }
  0xec   : > { %2628 = vmatpush3.bf16.xpose.msk.msra.mxu1 %vm2627_vm5, %v2626_v26 }
  0xf3   : > { %2476 = vmatmul.mubr.msk.f32.vlgmr.msra.gmra.mrb[2].mxu1 %vm481_vm4, %v484_v27 }
 0x1be   : > { %v2496_v28 = vpop.f32.mrb[0].mxu0 }
 0x1bf   : > { %650 = vst.msk [vmem:[#allocation6 + $0x8] sm:$0xff] %vm648_vm6, %v2496_v28  ;;  %v639_v29 = vpop.f32.mrb[1].mxu0 }
 0x1c0   : > { %649 = vst.msk [vmem:[#allocation6] sm:$0xff] %vm648_vm6, %v639_v29 }
 0x1c6   : > { %v560_v30 = vpop.f32.mrb[2].mxu1 }
 0x1c7   : > { %564 = vst.msk [vmem:[#allocation5] sm:$0xff] %vm399_vm2, %v560_v30  ;;  %v2477_v31 = vpop.f32.mrb[3].mxu1 }
 0x1c8 PF: > { %p2336_p5 = scmp.ne.s32.totalorder %s2928_s13, 0 }
 0x1c9   : > { %v657_v32 = vld [vmem:[#allocation6] sm:$0xff] (!%p2336_p5)  ;;  %v2941_v33 = vmov (!%p2336_p5), 1   ;;  %v2942_v34 = vmov (!%p2336_p5), 0   ;;  %v658_v35 = vld [vmem:[#allocation6 + $0x8] sm:$0xff] (!%p2336_p5)  ;;  %v2943_v36 = vmov (!%p2336_p5), 2   ;;  %v2944_v37 = vmov (!%p2336_p5), 3  }
 0x1ca   : > { %653 = sbr.rel (%p2336_p5) target bundleno = 1283 (0x503), region = 68  ;;  %2786 = vset.pattern.permute.xlu1 (!%p2336_p5), %v2941_v33  ;;  %2785 = vset.pattern.permute.xlu0 (!%p2336_p5), %v2942_v34  ;;  %v2945_v38 = vmov (!%p2336_p5), 4   ;;  %v2946_v39 = vmov (!%p2336_p5), 5   ;;  %v2947_v40 = vmov (!%p2336_p5), 6   ;;  %v654_v41 = vld [vmem:[#allocation2] sm:$0xff] (!%p2336_p5)  ;;  %v655_v42 = vld [vmem:[#allocation2 + $0x8] sm:$0xff] (!%p2336_p5) }
 0x1cb   : > { %790 = vperm.xlu1 (!%p2336_p5), %2786, %v657_v32   ;;  %662 = vperm.xlu0 (!%p2336_p5), %2785, %v657_v32   ;;  %v3095_v43 = vpack.i.bf16 (!%p2336_p5), %v655_v42, %v654_v41  ;;  %s2948_s29 = smov (!%p2336_p5), 112   ;;  %v2949_v44 = vmov (!%p2336_p5), 7   ;;  %s2950_s30 = smov (!%p2336_p5), 120   ;;  %v2645_v45 = vpack.c.bf16 (!%p2336_p5), %v655_v42, %v654_v41  ;;  %vm684_vm9 = vcmask (!%p2336_p5), 130048  }
 0x1cc   : > { %s2951_s11 = smov (!%p2336_p5), 104   ;;  %s2952_s12 = smov (!%p2336_p5), 96  }
 0x1cd   : > { %2646 = vmatprep.subr.bf16.mxu0 (!%p2336_p5), %v2645_v45  ;;  %s2953_s17 = smov (!%p2336_p5), 88   ;;  %s2954_s18 = smov (!%p2336_p5), 80  }
 0x1ce   : > { %2648 = vmatpush3.bf16.msra.mxu0 (!%p2336_p5), %v2645_v45  ;;  %v2340_v46 = vld [vmem:[#allocation5 + $0x1] ss:$0 sm:$0xff] (!%p2336_p5)  ;;  %v2337_v47 = vld [vmem:[#allocation5] ss:$0 sm:$0xff] (!%p2336_p5)  ;;  %v2343_v61 = vld [vmem:[#allocation5 + $0x2] ss:$0 sm:$0xff] (!%p2336_p5) }
 0x1cf   : > { %794 = vperm.xlu1 (!%p2336_p5), %2786, %v658_v35   ;;  %667 = vperm.xlu0 (!%p2336_p5), %2785, %v658_v35   ;;  %v2346_v13 = vld [vmem:[#allocation5 + $0x3] ss:$0 sm:$0xff] (!%p2336_p5)  ;;  %v2349_v25 = vld [vmem:[#allocation5 + $0x4] ss:$0 sm:$0xff] (!%p2336_p5)  ;;  %v2352_v28 = vld [vmem:[#allocation5 + $0x5] ss:$0 sm:$0xff] (!%p2336_p5) }
 0x1d0   : > { %v2355_v42 = vld [vmem:[#allocation5 + $0x6] ss:$0 sm:$0xff] (!%p2336_p5)  ;;  %s2955_s19 = smov (!%p2336_p5), 72   ;;  %s2956_s20 = smov (!%p2336_p5), 8  }
 0x1d1   : > { %s2957_s21 = smov 16   ;;  %s2958_s22 = smov 24  }
 0x1d2   : > { %s2959_s23 = smov 32   ;;  %s2960_s24 = smov 40  }
 0x1d3   : > { %2788 = vset.pattern.permute.xlu1 %v2943_v36  ;;  %2787 = vset.pattern.permute.xlu0 %v2943_v36  ;;  %s2961_s25 = smov 48   ;;  %s2962_s26 = smov 56  }
 0x1d4   : > { %928 = vperm.xlu1 %2788, %v658_v35   ;;  %924 = vperm.xlu0 %2787, %v657_v32  }
 0x1d8   : > { %2789 = vset.pattern.permute.xlu1 %v2944_v37  ;;  %2790 = vset.pattern.permute.xlu0 %v2944_v37 }
 0x1d9   : > { %1056 = vperm.xlu1 %2789, %v657_v32   ;;  %1060 = vperm.xlu0 %2790, %v658_v35  }
 0x1dd   : > { %2791 = vset.pattern.permute.xlu1 %v2945_v38  ;;  %2792 = vset.pattern.permute.xlu0 %v2946_v39 }
 0x1de   : > { %1188 = vperm.xlu1 %2791, %v657_v32   ;;  %1320 = vperm.xlu0 %2792, %v657_v32  }
 0x1e2   : > { %1192 = vperm.xlu1 %2791, %v658_v35   ;;  %2795 = vset.pattern.permute.xlu0 %v2947_v40 }
 0x1e3   : > { %1456 = vperm.xlu0 %2795, %v658_v35  }
 0x1e6   : > { %2793 = vset.pattern.permute.xlu1 %v2946_v39 }
 0x1e7   : > { %1324 = vperm.xlu1 %2793, %v658_v35   ;;  %2803 = vrot.lane.b32.xlu0 %v3095_v43, %s2948_s29 }
 0x1e8   : > { %2832 = vset.pattern.permute.xlu0 %v2949_v44 }
 0x1eb   : > { %2794 = vset.pattern.permute.xlu1 %v2947_v40 }
 0x1ec   : > { %1452 = vperm.xlu1 %2794, %v657_v32  }
 0x1f0   : > { %2796 = vset.pattern.permute.xlu1 %v2949_v44 }
 0x1f1   : > { %1584 = vperm.xlu1 %2796, %v657_v32  }
 0x1f5   : > { %1588 = vperm.xlu1 %2796, %v658_v35  }
 0x1f9   : > { %2798 = vrot.lane.b32.xlu1 %v3095_v43, %s2950_s30 }
 0x1fd   : > { %2808 = vrot.lane.b32.xlu1 %v3095_v43, %s2951_s11 }
 0x24a   : > { %v791_v48 = vpop.permute.xlu1 %790  ;;  %v663_v49 = vpop.permute.xlu0 %662 }
 0x24b   : > { %v801_v50 = vadd.f32 %v2340_v46, %v791_v48  ;;  %v674_v51 = vadd.f32 %v2337_v47, %v663_v49 }
 0x24d   : > { %v805_v52 = vmul.f32 0.2, %v801_v50  ;;  %v678_v53 = vmul.f32 0.2, %v674_v51  ;;  %vm676_vm7 = vcmp.ge.f32.partialorder %v674_v51, 0.0  ;;  %vm803_vm8 = vcmp.ge.f32.partialorder %v801_v50, 0.0 }
 0x24e   : > { %v795_v54 = vpop.permute.xlu1 %794  ;;  %v668_v55 = vpop.permute.xlu0 %667 }
 0x24f   : > { %v802_v56 = vadd.f32 %v2340_v46, %v795_v54  ;;  %v675_v57 = vadd.f32 %v2337_v47, %v668_v55  ;;  %v680_v58 = vsel %vm676_vm7, %v674_v51, %v678_v53  ;;  %v807_v59 = vsel %vm803_vm8, %v801_v50, %v805_v52 }
 0x250   : > { %v3102_v60 = vsel %vm387_vm0, %v680_v58, -1e+30  ;;  %v3108_v1 = vsel %vm387_vm0, %v807_v59, -1e+30 }
 0x251   : > { %v806_v62 = vmul.f32 0.2, %v802_v56  ;;  %v679_v63 = vmul.f32 0.2, %v675_v57  ;;  %v685_v0 = vsel %vm684_vm9, %v3102_v60, -inf  ;;  %vm677_vm10 = vcmp.ge.f32.partialorder %v675_v57, 0.0 }
 0x252   : > { %686 = vmax.xlane.f32.xlu0 %v685_v0  ;;  %vm804_vm11 = vcmp.ge.f32.partialorder %v802_v56, 0.0  ;;  %v811_v11 = vsel %vm684_vm9, %v3108_v1, -inf }
 0x253   : > { %v929_v2 = vpop.permute.xlu1 %928  ;;  %v925_v5 = vpop.permute.xlu0 %924  ;;  %v681_v6 = vsel %vm677_vm10, %v675_v57, %v679_v63  ;;  %v808_v7 = vsel %vm804_vm11, %v802_v56, %v806_v62  ;;  %vm1770_vm11 = vcmask 64512  }
 0x254   : > { %v936_v8 = vadd.f32 %v2343_v61, %v929_v2  ;;  %v935_v9 = vadd.f32 %v2343_v61, %v925_v5  ;;  %v3112_v10 = vsel %vm388_vm1, %v681_v6, -1e+30  ;;  %v3120_v14 = vsel %vm388_vm1, %v808_v7, -1e+30 }
 0x255   : > { %v688_v12 = vsel %vm684_vm9, %v3112_v10, -inf  ;;  %v814_v23 = vsel %vm684_vm9, %v3120_v14, -inf }
 0x256   : > { %v940_v15 = vmul.f32 0.2, %v936_v8  ;;  %v939_v16 = vmul.f32 0.2, %v935_v9  ;;  %812 = vmax.xlane.f32.xlu0 %v811_v11  ;;  %689 = vmax.xlane.f32.xlu1 %v688_v12  ;;  %vm937_vm12 = vcmp.ge.f32.partialorder %v935_v9, 0.0  ;;  %vm938_vm13 = vcmp.ge.f32.partialorder %v936_v8, 0.0 }
 0x258   : > { %v1057_v17 = vpop.permute.xlu1 %1056  ;;  %v1061_v18 = vpop.permute.xlu0 %1060  ;;  %v941_v19 = vsel %vm937_vm12, %v935_v9, %v939_v16  ;;  %v942_v20 = vsel %vm938_vm13, %v936_v8, %v940_v15  ;;  %vm1775_vm12 = vcmask 195584   ;;  %vm1778_vm13 = vcmask 261120  }
 0x259   : > { %v1067_v21 = vadd.f32 %v2346_v13, %v1057_v17  ;;  %v1068_v22 = vadd.f32 %v2346_v13, %v1061_v18  ;;  %v3126_v24 = vsel %vm387_vm0, %v941_v19, -1e+30  ;;  %v3132_v27 = vsel %vm388_vm1, %v942_v20, -1e+30  ;;  %v2358_v18 = vld [vmem:[#allocation5 + $0x7] ss:$0 sm:$0xff] }
 0x25a   : > { %815 = vmax.xlane.f32.xlu0 %v814_v23  ;;  %v945_v26 = vsel %vm684_vm9, %v3126_v24, -inf  ;;  %v948_v32 = vsel %vm684_vm9, %v3132_v27, -inf }
 0x25b   : > { %v1071_v29 = vmul.f32 0.2, %v1067_v21  ;;  %v1072_v30 = vmul.f32 0.2, %v1068_v22  ;;  %946 = vmax.xlane.f32.xlu1 %v945_v26  ;;  %vm1069_vm14 = vcmp.ge.f32.partialorder %v1067_v21, 0.0  ;;  %vm1070_vm15 = vcmp.ge.f32.partialorder %v1068_v22, 0.0 }
 0x25d   : > { %v1189_v31 = vpop.permute.xlu1 %1188  ;;  %v1073_v33 = vsel %vm1069_vm14, %v1067_v21, %v1071_v29  ;;  %v1321_v34 = vpop.permute.xlu0 %1320  ;;  %v1074_v35 = vsel %vm1070_vm15, %v1068_v22, %v1072_v30  ;;  %vm1781_vm14 = vcmask 326656   ;;  %vm1784_vm15 = vcmask 392192  }
 0x25e   : > { %v1199_v36 = vadd.f32 %v2349_v25, %v1189_v31  ;;  %949 = vmax.xlane.f32.xlu0 %v948_v32  ;;  %v3138_v37 = vsel %vm387_vm0, %v1073_v33, -1e+30  ;;  %v1331_v38 = vadd.f32 %v2352_v28, %v1321_v34  ;;  %v3142_v39 = vsel %vm388_vm1, %v1074_v35, -1e+30 }
 0x25f   : > { %v1077_v40 = vsel %vm684_vm9, %v3138_v37, -inf  ;;  %v1080_v41 = vsel %vm684_vm9, %v3142_v39, -inf }
 0x260   : > { %v1203_v44 = vmul.f32 0.2, %v1199_v36  ;;  %1078 = vmax.xlane.f32.xlu1 %v1077_v40  ;;  %v1335_v45 = vmul.f32 0.2, %v1331_v38  ;;  %vm1201_vm2 = vcmp.ge.f32.partialorder %v1199_v36, 0.0  ;;  %vm1333_vm3 = vcmp.ge.f32.partialorder %v1331_v38, 0.0 }
 0x261   : > { %v1193_v46 = vpop.permute.xlu1 %1192 }
 0x262   : > { %v1200_v47 = vadd.f32 %v2349_v25, %v1193_v46  ;;  %1081 = vmax.xlane.f32.xlu0 %v1080_v41  ;;  %v1205_v48 = vsel %vm1201_vm2, %v1199_v36, %v1203_v44  ;;  %v1337_v49 = vsel %vm1333_vm3, %v1331_v38, %v1335_v45  ;;  %v1457_v50 = vpop.permute.xlu0 %1456  ;;  %vm1787_vm2 = vcmask 457728  }
 0x263   : > { %v3150_v51 = vsel %vm387_vm0, %v1205_v48, -1e+30  ;;  %v3154_v52 = vsel %vm387_vm0, %v1337_v49, -1e+30  ;;  %v1464_v53 = vadd.f32 %v2355_v42, %v1457_v50 }
 0x264   : > { %v1204_v54 = vmul.f32 0.2, %v1200_v47  ;;  %v1209_v55 = vsel %vm684_vm9, %v3150_v51, -inf  ;;  %vm1202_vm4 = vcmp.ge.f32.partialorder %v1200_v47, 0.0  ;;  %v1341_v59 = vsel %vm684_vm9, %v3154_v52, -inf }
 0x265   : > { %1210 = vmax.xlane.f32.xlu1 %v1209_v55  ;;  %v1468_v56 = vmul.f32 0.2, %v1464_v53  ;;  %vm1466_vm5 = vcmp.ge.f32.partialorder %v1464_v53, 0.0 }
 0x266   : > { %v1325_v57 = vpop.permute.xlu1 %1324  ;;  %v1206_v58 = vsel %vm1202_vm4, %v1200_v47, %v1204_v54  ;;  %v2804_v61 = vpop.permute.xlu0 %2803 }
 0x267   : > { %v1332_v62 = vadd.f32 %v2352_v28, %v1325_v57  ;;  %v3162_v63 = vsel %vm388_vm1, %v1206_v58, -1e+30  ;;  %v2806_v0 = vunpack.i.h.bf16 %v2804_v61  ;;  %v2805_v5 = vunpack.i.l.bf16 %v2804_v61 }
 0x268   : > { %v1212_v2 = vsel %vm684_vm9, %v3162_v63, -inf  ;;  %v1470_v7 = vsel %vm1466_vm5, %v1464_v53, %v1468_v56 }
 0x269   : > { %v1336_v6 = vmul.f32 0.2, %v1332_v62  ;;  %1213 = vmax.xlane.f32.xlu0 %v1212_v2  ;;  %1342 = vmax.xlane.f32.xlu1 %v1341_v59  ;;  %vm1334_vm6 = vcmp.ge.f32.partialorder %v1332_v62, 0.0  ;;  %v3166_v8 = vpack.c.bf16 %v2806_v0, %v2805_v5  ;;  %v3174_v15 = vsel %vm388_vm1, %v1470_v7, -1e+30 }
 0x26a   : > { %v1476_v19 = vsel %vm684_vm9, %v3174_v15, -inf }
 0x26b   : > { %v1453_v9 = vpop.permute.xlu1 %1452  ;;  %v1338_v11 = vsel %vm1334_vm6, %v1332_v62, %v1336_v6  ;;  %2654 = vmatprep.subr.bf16.mxu0 %v3166_v8 }
 0x26c   : > { %v1463_v12 = vadd.f32 %v2355_v42, %v1453_v9  ;;  %v3170_v13 = vsel %vm388_vm1, %v1338_v11, -1e+30 }
 0x26d   : > { %v1344_v16 = vsel %vm684_vm9, %v3170_v13, -inf }
 0x26e   : > { %v1467_v17 = vmul.f32 0.2, %v1463_v12  ;;  %1345 = vmax.xlane.f32.xlu0 %v1344_v16  ;;  %vm1465_vm7 = vcmp.ge.f32.partialorder %v1463_v12, 0.0 }
 0x270   : > { %v1585_v20 = vpop.permute.xlu1 %1584  ;;  %v1469_v21 = vsel %vm1465_vm7, %v1463_v12, %v1467_v17 }
 0x271   : > { %v1595_v22 = vadd.f32 %v2358_v18, %v1585_v20  ;;  %v3183_v23 = vsel %vm387_vm0, %v1469_v21, -1e+30 }
 0x272   : > { %1477 = vmax.xlane.f32.xlu0 %v1476_v19  ;;  %v1473_v25 = vsel %vm684_vm9, %v3183_v23, -inf }
 0x273   : > { %v1599_v26 = vmul.f32 0.2, %v1595_v22  ;;  %1474 = vmax.xlane.f32.xlu1 %v1473_v25  ;;  %vm1597_vm8 = vcmp.ge.f32.partialorder %v1595_v22, 0.0 }
 0x274   : > { %v1589_v28 = vpop.permute.xlu1 %1588 }
 0x275   : > { %v1596_v29 = vadd.f32 %v2358_v18, %v1589_v28  ;;  %v1601_v30 = vsel %vm1597_vm8, %v1595_v22, %v1599_v26 }
 0x276   : > { %v3189_v31 = vsel %vm387_vm0, %v1601_v30, -1e+30 }
 0x277   : > { %v1600_v32 = vmul.f32 0.2, %v1596_v29  ;;  %v1605_v33 = vsel %vm684_vm9, %v3189_v31, -inf  ;;  %vm1598_vm10 = vcmp.ge.f32.partialorder %v1596_v29, 0.0 }
 0x278   : > { %1606 = vmax.xlane.f32.xlu1 %v1605_v33  ;;  %v2799_v34 = vpop.permute.xlu1 %2798 }
 0x279   : > { %v1602_v35 = vsel %vm1598_vm10, %v1596_v29, %v1600_v32  ;;  %v2801_v36 = vunpack.i.h.bf16 %v2799_v34  ;;  %v2800_v38 = vunpack.i.l.bf16 %v2799_v34 }
 0x27a   : > { %v3195_v40 = vsel %vm388_vm1, %v1602_v35, -1e+30 }
 0x27b   : > { %v1608_v41 = vsel %vm684_vm9, %v3195_v40, -inf  ;;  %v2649_v42 = vpack.c.bf16 %v2801_v36, %v2800_v38 }
 0x27c   : > { %1609 = vmax.xlane.f32.xlu0 %v1608_v41  ;;  %v2809_v44 = vpop.permute.xlu1 %2808 }
 0x27d   : > { %v2811_v45 = vunpack.i.h.bf16 %v2809_v44  ;;  %v2810_v46 = vunpack.i.l.bf16 %v2809_v44  ;;  %2650 = vmatprep.subr.bf16.mxu1 %v2649_v42 }
 0x27e   : > { %2652 = vmatpush3.bf16.msra.mxu1 %v2649_v42 }
 0x27f   : > { %v3199_v47 = vpack.c.bf16 %v2811_v45, %v2810_v46 }
 0x281   : > { %2658 = vmatprep.subr.bf16.mxu1 %v3199_v47 }
 0x289   : > { %2813 = vrot.lane.b32.xlu1 %v3095_v43, %s2952_s12 }
 0x292   : > { %2818 = vrot.lane.b32.xlu0 %v3095_v43, %s2953_s17 }
 0x2df   : > { %v687_v48 = vpop.xlane.xlu0 %686 }
 0x2e0   : > { %v691_v49 = vsub.f32 %v3102_v60, %v687_v48 }
 0x2e2   : > { %v693_v50 = vmul.f32 1.442695, %v691_v49 }
 0x2e3   : > { %v813_v53 = vpop.xlane.xlu0 %812  ;;  %v690_v54 = vpop.xlane.xlu1 %689 }
 0x2e4   : > { %2833 = vpow2.f32 %v693_v50  ;;  %v817_v55 = vsub.f32 %v3108_v1, %v813_v53  ;;  %v692_v56 = vsub.f32 %v3112_v10, %v690_v54 }
 0x2e6   : > { %v819_v57 = vmul.f32 1.442695, %v817_v55  ;;  %v695_v58 = vmul.f32 1.442695, %v692_v56 }
 0x2e7   : > { %v816_v59 = vpop.xlane.xlu0 %815 }
 0x2e8   : > { %2835 = vpow2.f32 %v819_v57  ;;  %v818_v61 = vsub.f32 %v3120_v14, %v816_v59  ;;  %v947_v62 = vpop.xlane.xlu1 %946 }
 0x2e9   : > { %2837 = vpow2.f32 %v695_v58  ;;  %v951_v0 = vsub.f32 %v3126_v24, %v947_v62 }
 0x2ea   : > { %v821_v2 = vmul.f32 1.442695, %v818_v61 }
 0x2eb   : > { %v953_v60 = vmul.f32 1.442695, %v951_v0  ;;  %v950_v5 = vpop.xlane.xlu0 %949 }
 0x2ec   : > { %2839 = vpow2.f32 %v821_v2  ;;  %v952_v6 = vsub.f32 %v3132_v27, %v950_v5 }
 0x2ed   : > { %2841 = vpow2.f32 %v953_v60  ;;  %v1079_v1 = vpop.xlane.xlu1 %1078 }
 0x2ee   : > { %v3210_v7 = vpop.eup %2833  ;;  %v955_v10 = vmul.f32 1.442695, %v952_v6  ;;  %v1083_v9 = vsub.f32 %v3138_v37, %v1079_v1 }
 0x2ef   : > { %v1082_v11 = vpop.xlane.xlu0 %1081  ;;  %v697_v14 = vsel %vm684_vm9, %v3210_v7, 0.0 }
 0x2f0   : > { %2843 = vpow2.f32 %v955_v10  ;;  %v1085_v12 = vmul.f32 1.442695, %v1083_v9  ;;  %v1084_v24 = vsub.f32 %v3142_v39, %v1082_v11  ;;  %698 = vadd.xlane.f32.xlu1 %v697_v14 }
 0x2f2   : > { %v3216_v16 = vpop.eup %2835  ;;  %2845 = vpow2.f32 %v1085_v12  ;;  %v1087_v27 = vmul.f32 1.442695, %v1084_v24  ;;  %v1211_v17 = vpop.xlane.xlu1 %1210 }
 0x2f3   : > { %v3218_v18 = vpop.eup %2837  ;;  %v1215_v19 = vsub.f32 %v3150_v51, %v1211_v17  ;;  %v823_v37 = vsel %vm684_vm9, %v3216_v16, 0.0 }
 0x2f4   : > { %2847 = vpow2.f32 %v1087_v27  ;;  %824 = vadd.xlane.f32.xlu1 %v823_v37  ;;  %v700_v20 = vsel %vm684_vm9, %v3218_v18, 0.0 }
 0x2f5   : > { %v1217_v21 = vmul.f32 1.442695, %v1215_v19  ;;  %701 = vadd.xlane.f32.xlu0 %v700_v20 }
 0x2f6   : > { %v3225_v39 = vpop.eup %2839  ;;  %v1214_v22 = vpop.xlane.xlu0 %1213 }
 0x2f7   : > { %v1343_v25 = vpop.xlane.xlu1 %1342  ;;  %v3227_v26 = vpop.eup %2841  ;;  %2849 = vpow2.f32 %v1217_v21  ;;  %v1216_v28 = vsub.f32 %v3162_v63, %v1214_v22  ;;  %v826_v29 = vsel %vm684_vm9, %v3225_v39, 0.0 }
 0x2f8   : > { %v1347_v51 = vsub.f32 %v3154_v52, %v1343_v25  ;;  %v957_v30 = vsel %vm684_vm9, %v3227_v26, 0.0 }
 0x2f9   : > { %v1219_v32 = vmul.f32 1.442695, %v1216_v28  ;;  %827 = vadd.xlane.f32.xlu0 %v826_v29  ;;  %958 = vadd.xlane.f32.xlu1 %v957_v30 }
 0x2fa   : > { %v1349_v33 = vmul.f32 1.442695, %v1347_v51  ;;  %v3235_v34 = vpop.eup %2843 }
 0x2fb   : > { %2851 = vpow2.f32 %v1219_v32  ;;  %v1346_v35 = vpop.xlane.xlu0 %1345  ;;  %v960_v36 = vsel %vm684_vm9, %v3235_v34, 0.0 }
 0x2fc   : > { %v3239_v63 = vpop.eup %2845  ;;  %2853 = vpow2.f32 %v1349_v33  ;;  %v1348_v52 = vsub.f32 %v3170_v13, %v1346_v35 }
 0x2fd   : > { %961 = vadd.xlane.f32.xlu0 %v960_v36  ;;  %v1089_v38 = vsel %vm684_vm9, %v3239_v63, 0.0 }
 0x2fe   : > { %v3244_v41 = vpop.eup %2847  ;;  %v1351_v42 = vmul.f32 1.442695, %v1348_v52  ;;  %1090 = vadd.xlane.f32.xlu1 %v1089_v38 }
 0x2ff   : > { %v1478_v44 = vpop.xlane.xlu0 %1477  ;;  %v1092_v45 = vsel %vm684_vm9, %v3244_v41, 0.0 }
 0x300   : > { %2855 = vpow2.f32 %v1351_v42  ;;  %v1480_v46 = vsub.f32 %v3174_v15, %v1478_v44  ;;  %v1475_v48 = vpop.xlane.xlu1 %1474 }
 0x301   : > { %v3249_v49 = vpop.eup %2849  ;;  %1093 = vadd.xlane.f32.xlu0 %v1092_v45  ;;  %v1479_v13 = vsub.f32 %v3183_v23, %v1475_v48 }
 0x302   : > { %v1483_v50 = vmul.f32 1.442695, %v1480_v46  ;;  %v1221_v53 = vsel %vm684_vm9, %v3249_v49, 0.0 }
 0x303   : > { %v1481_v54 = vmul.f32 1.442695, %v1479_v13  ;;  %1222 = vadd.xlane.f32.xlu1 %v1221_v53 }
 0x304   : > { %2857 = vpow2.f32 %v1483_v50 }
 0x305   : > { %v3254_v55 = vpop.eup %2851  ;;  %2859 = vpow2.f32 %v1481_v54  ;;  %v1607_v56 = vpop.xlane.xlu1 %1606 }
 0x306   : > { %v3256_v57 = vpop.eup %2853  ;;  %v1611_v15 = vsub.f32 %v3189_v31, %v1607_v56  ;;  %v1224_v58 = vsel %vm684_vm9, %v3254_v55, 0.0 }
 0x307   : > { %1225 = vadd.xlane.f32.xlu0 %v1224_v58  ;;  %v1353_v23 = vsel %vm684_vm9, %v3256_v57, 0.0 }
 0x308   : > { %v1613_v59 = vmul.f32 1.442695, %v1611_v15  ;;  %1354 = vadd.xlane.f32.xlu1 %v1353_v23 }
 0x309   : > { %v1610_v61 = vpop.xlane.xlu0 %1609  ;;  %v2814_v14 = vpop.permute.xlu1 %2813 }
 0x30a   : > { %v3263_v62 = vpop.eup %2855  ;;  %2861 = vpow2.f32 %v1613_v59  ;;  %v1612_v0 = vsub.f32 %v3195_v40, %v1610_v61  ;;  %v2816_v28 = vunpack.i.h.bf16 %v2814_v14  ;;  %v2815_v51 = vunpack.i.l.bf16 %v2814_v14 }
 0x30b   : > { %v1356_v2 = vsel %vm684_vm9, %v3263_v62, 0.0 }
 0x30c   : > { %v1615_v60 = vmul.f32 1.442695, %v1612_v0  ;;  %1357 = vadd.xlane.f32.xlu0 %v1356_v2  ;;  %v2661_v35 = vpack.c.bf16 %v2816_v28, %v2815_v51 }
 0x30d   : > { %v2819_v24 = vpop.permute.xlu0 %2818 }
 0x30e   : > { %v3268_v31 = vpop.eup %2857  ;;  %2863 = vpow2.f32 %v1615_v60  ;;  %v2820_v36 = vunpack.i.l.bf16 %v2819_v24 }
 0x30f   : > { %v3270_v5 = vpop.eup %2859  ;;  %v1488_v6 = vsel %vm684_vm9, %v3268_v31, 0.0 }
 0x310   : > { %1489 = vadd.xlane.f32.xlu0 %v1488_v6  ;;  %v1485_v1 = vsel %vm684_vm9, %v3270_v5, 0.0 }
 0x311   : > { %1486 = vadd.xlane.f32.xlu1 %v1485_v1 }
 0x314   : > { %v3276_v10 = vpop.eup %2861 }
 0x315   : > { %v1617_v40 = vsel %vm684_vm9, %v3276_v10, 0.0 }
 0x316   : > { %1618 = vadd.xlane.f32.xlu1 %v1617_v40 }
 0x318   : > { %v3280_v9 = vpop.eup %2863 }
 0x319   : > { %v1620_v11 = vsel %vm684_vm9, %v3280_v9, 0.0 }
 0x31a   : > { %1621 = vadd.xlane.f32.xlu0 %v1620_v11 }
 0x327   : > { %2823 = vrot.lane.b32.xlu1 %v3095_v43, %s2954_s18 }
 0x330   : > { %2828 = vrot.lane.b32.xlu0 %v3095_v43, %s2955_s19 }
 0x37d   : > { %v699_v12 = vpop.xlane.xlu1 %698 }
 0x37e   : > { %2865 = vrcp.f32 %v699_v12 }
 0x381   : > { %v825_v27 = vpop.xlane.xlu1 %824 }
 0x382   : > { %v702_v17 = vpop.xlane.xlu0 %701  ;;  %2867 = vrcp.f32 %v825_v27 }
 0x383   : > { %2869 = vrcp.f32 %v702_v17 }
 0x386   : > { %v828_v19 = vpop.xlane.xlu0 %827  ;;  %v959_v37 = vpop.xlane.xlu1 %958 }
 0x387   : > { %2871 = vrcp.f32 %v828_v19 }
 0x388   : > { %v2866_v20 = vpop.eup %2865  ;;  %2873 = vrcp.f32 %v959_v37 }
 0x389   : > { %v705_v21 = vmul.f32 %v2866_v20, %v3210_v7  ;;  %v2821_v7 = vunpack.i.h.bf16 %v2819_v24 }
 0x38a   : > { %v962_v22 = vpop.xlane.xlu0 %961 }
 0x38b   : > { %2875 = vrcp.f32 %v962_v22  ;;  %2501 = vmatprep.mubr.msk.f32.mxu0 %vm684_vm9, %v705_v21  ;;  %v1091_v43 = vpop.xlane.xlu1 %1090 }
 0x38c   : > { %v2868_v25 = vpop.eup %2867  ;;  %2877 = vrcp.f32 %v1091_v43 }
 0x38d   : > { %v2870_v29 = vpop.eup %2869  ;;  %v831_v30 = vmul.f32 %v2868_v25, %v3216_v16 }
 0x38e   : > { %v1094_v32 = vpop.xlane.xlu0 %1093  ;;  %v706_v33 = vmul.f32 %v2870_v29, %v3218_v18  ;;  %v2665_v18 = vpack.c.bf16 %v2821_v7, %v2820_v36 }
 0x38f   : > { %2879 = vrcp.f32 %v1094_v32  ;;  %2508 = vmatprep.mubr.msk.f32.mxu1 %vm684_vm9, %v831_v30 }
 0x390   : > { %2502 = vmatmul.mubr.msk.f32.vlgmr.msra.gmra.mrb[0].mxu0 %vm684_vm9, %v706_v33  ;;  %v1223_v52 = vpop.xlane.xlu1 %1222 }
 0x391   : > { %v2872_v38 = vpop.eup %2871  ;;  %2656 = vmatpush3.bf16.msra.mxu0 %v3166_v8  ;;  %2881 = vrcp.f32 %v1223_v52 }
 0x392   : > { %v2874_v42 = vpop.eup %2873  ;;  %2662 = vmatprep.subr.bf16.mxu0 %v2661_v35  ;;  %v832_v16 = vmul.f32 %v2872_v38, %v3225_v39 }
 0x393   : > { %v965_v44 = vmul.f32 %v2874_v42, %v3227_v26 }
 0x394   : > { %2509 = vmatmul.mubr.msk.f32.vlgmr.msra.gmra.mrb[0].mxu1 %vm684_vm9, %v832_v16  ;;  %v1226_v45 = vpop.xlane.xlu0 %1225 }
 0x395   : > { %v2876_v46 = vpop.eup %2875  ;;  %2660 = vmatpush3.bf16.msra.mxu1 %v3199_v47  ;;  %2883 = vrcp.f32 %v1226_v45  ;;  %v1355_v48 = vpop.xlane.xlu1 %1354  ;;  %2515 = vmatprep.mubr.msk.f32.mxu0 %vm684_vm9, %v965_v44 }
 0x396   : > { %v2878_v13 = vpop.eup %2877  ;;  %v966_v8 = vmul.f32 %v2876_v46, %v3235_v34  ;;  %2885 = vrcp.f32 %v1355_v48  ;;  %2666 = vmatprep.subr.bf16.mxu1 %v2665_v18 }
 0x397   : > { %v1097_v39 = vmul.f32 %v2878_v13, %v3239_v63 }
 0x398   : > { %2516 = vmatmul.mubr.msk.f32.vlgmr.msra.gmra.mrb[2].mxu0 %vm684_vm9, %v966_v8 }
 0x399   : > { %v2880_v26 = vpop.eup %2879  ;;  %2664 = vmatpush3.bf16.msra.mxu0 %v2661_v35  ;;  %v1358_v50 = vpop.xlane.xlu0 %1357  ;;  %2522 = vmatprep.mubr.msk.f32.mxu1 %vm684_vm9, %v1097_v39 }
 0x39a   : > { %v1098_v47 = vmul.f32 %v2880_v26, %v3244_v41  ;;  %2887 = vrcp.f32 %v1358_v50 }
 0x39b   : > { %v2882_v53 = vpop.eup %2881 }
 0x39c   : > { %2523 = vmatmul.mubr.msk.f32.vlgmr.msra.gmra.mrb[2].mxu1 %vm684_vm9, %v1098_v47  ;;  %v1229_v54 = vmul.f32 %v2882_v53, %v3249_v49 }
 0x39d   : > { %2668 = vmatpush3.bf16.msra.mxu1 %v2665_v18  ;;  %v1490_v34 = vpop.xlane.xlu0 %1489 }
 0x39e   : > { %v1487_v56 = vpop.xlane.xlu1 %1486  ;;  %2529 = vmatprep.mubr.msk.f32.mxu0 %vm684_vm9, %v1229_v54 }
 0x39f   : > { %v2884_v63 = vpop.eup %2883  ;;  %2889 = vrcp.f32 %v1487_v56  ;;  %v2361_v56 = vld [vmem:[%s3440_s4] ss:$0 sm:$0xff] }
 0x3a0   : > { %v2886_v15 = vpop.eup %2885  ;;  %v1230_v58 = vmul.f32 %v2884_v63, %v3254_v55  ;;  %2891 = vrcp.f32 %v1490_v34 }
 0x3a1   : > { %v1361_v23 = vmul.f32 %v2886_v15, %v3256_v57 }
 0x3a2   : > { %2530 = vmatmul.mubr.msk.f32.vlgmr.msra.gmra.mrb[4].mxu0 %vm684_vm9, %v1230_v58 }
 0x3a3   : > { %2536 = vmatprep.mubr.msk.f32.mxu1 %vm684_vm9, %v1361_v23  ;;  %v1619_v41 = vpop.xlane.xlu1 %1618 }
 0x3a4   : > { %v2888_v59 = vpop.eup %2887  ;;  %2893 = vrcp.f32 %v1619_v41 }
 0x3a5   : > { %v1362_v49 = vmul.f32 %v2888_v59, %v3263_v62 }
 0x3a7   : > { %v1622_v61 = vpop.xlane.xlu0 %1621  ;;  %v2824_v0 = vpop.permute.xlu1 %2823  ;;  %2537 = vmatmul.mubr.msk.f32.vlgmr.msra.gmra.mrb[4].mxu1 %vm684_vm9, %v1362_v49 }
 0x3a8   : > { %2895 = vrcp.f32 %v1622_v61  ;;  %v2826_v2 = vunpack.i.h.bf16 %v2824_v0  ;;  %v2825_v60 = vunpack.i.l.bf16 %v2824_v0 }
 0x3a9   : > { %v2890_v55 = vpop.eup %2889 }
 0x3aa   : > { %v2669_v6 = vpack.c.bf16 %v2826_v2, %v2825_v60  ;;  %v1493_v57 = vmul.f32 %v2890_v55, %v3270_v5  ;;  %v2892_v1 = vpop.eup %2891 }
 0x3ab   : > { %v2829_v40 = vpop.permute.xlu0 %2828  ;;  %v1494_v12 = vmul.f32 %v2892_v1, %v3268_v31 }
 0x3ac   : > { %v2831_v11 = vunpack.i.h.bf16 %v2829_v40  ;;  %v2830_v14 = vunpack.i.l.bf16 %v2829_v40  ;;  %2670 = vmatprep.subr.bf16.mxu0 %v2669_v6  ;;  %2543 = vmatprep.mubr.msk.f32.mxu0 %vm684_vm9, %v1493_v57 }
 0x3ad   : > { %2672 = vmatpush3.bf16.msra.mxu0 %v2669_v6 }
 0x3ae   : > { %v2894_v62 = vpop.eup %2893  ;;  %v2673_v24 = vpack.c.bf16 %v2831_v11, %v2830_v14 }
 0x3af   : > { %v1625_v27 = vmul.f32 %v2894_v62, %v3276_v10 }
 0x3b0   : > { %2544 = vmatmul.mubr.msk.f32.vlgmr.msra.gmra.mrb[6].mxu0 %vm684_vm9, %v1494_v12  ;;  %2674 = vmatprep.subr.bf16.mxu1 %v2673_v24 }
 0x3b1   : > { %2676 = vmatpush3.bf16.msra.mxu1 %v2673_v24  ;;  %2550 = vmatprep.mubr.msk.f32.mxu1 %vm684_vm9, %v1625_v27 }
 0x3b2   : > { %v2896_v5 = vpop.eup %2895 }
 0x3b3   : > { %v1626_v17 = vmul.f32 %v2896_v5, %v3280_v9 }
 0x3b5   : > { %2551 = vmatmul.mubr.msk.f32.vlgmr.msra.gmra.mrb[6].mxu1 %vm684_vm9, %v1626_v17 }
 0x463   : > { %v2503_v19 = vpop.f32.mrb[0].mxu0 }
 0x464   : > { %v779_v37 = vpop.f32.mrb[1].mxu0 }
 0x467   : > { %v2510_v20 = vpop.f32.mrb[0].mxu1 }
 0x468   : > { %1718 = vrot.lane.b32.xlu0 %v2510_v20, %s2956_s20  ;;  %v913_v31 = vpop.f32.mrb[1].mxu1 }
 0x469   : > { %1716 = vrot.lane.b32.xlu1 %v913_v31, %s2956_s20 }
 0x46b   : > { %v2517_v21 = vpop.f32.mrb[2].mxu0 }
 0x46c   : > { %1726 = vrot.lane.b32.xlu0 %v2517_v21, %s2957_s21  ;;  %v1045_v10 = vpop.f32.mrb[3].mxu0 }
 0x46d   : > { %1724 = vrot.lane.b32.xlu1 %v1045_v10, %s2957_s21 }
 0x46f   : > { %v2524_v22 = vpop.f32.mrb[2].mxu1 }
 0x470   : > { %v1177_v43 = vpop.f32.mrb[3].mxu1  ;;  %1734 = vrot.lane.b32.xlu0 %v2524_v22, %s2958_s22 }
 0x471   : > { %1732 = vrot.lane.b32.xlu1 %v1177_v43, %s2958_s22 }
 0x475   : > { %v2531_v9 = vpop.f32.mrb[4].mxu0 }
 0x476   : > { %1742 = vrot.lane.b32.xlu0 %v2531_v9, %s2959_s23  ;;  %v1309_v25 = vpop.f32.mrb[5].mxu0 }
 0x477   : > { %1740 = vrot.lane.b32.xlu1 %v1309_v25, %s2959_s23 }
 0x47a   : > { %v2538_v28 = vpop.f32.mrb[4].mxu1 }
 0x47b   : > { %v1441_v51 = vpop.f32.mrb[5].mxu1  ;;  %1750 = vrot.lane.b32.xlu0 %v2538_v28, %s2960_s24 }
 0x47c   : > { %1748 = vrot.lane.b32.xlu1 %v1441_v51, %s2960_s24 }
 0x483   : > { %v2545_v29 = vpop.f32.mrb[6].mxu0 }
 0x484   : > { %1758 = vrot.lane.b32.xlu0 %v2545_v29, %s2961_s25  ;;  %v1573_v30 = vpop.f32.mrb[7].mxu0 }
 0x485   : > { %1756 = vrot.lane.b32.xlu1 %v1573_v30, %s2961_s25 }
 0x488   : > { %v2552_v32 = vpop.f32.mrb[6].mxu1 }
 0x489   : > { %v1705_v33 = vpop.f32.mrb[7].mxu1  ;;  %1766 = vrot.lane.b32.xlu0 %v2552_v32, %s2962_s26 }
 0x48a   : > { %1764 = vrot.lane.b32.xlu1 %v1705_v33, %s2962_s26 }
 0x4da   : > { %v1719_v35 = vpop.permute.xlu0 %1718 }
 0x4db   : > { %v1717_v7 = vpop.permute.xlu1 %1716  ;;  %v1772_v46 = vsel %vm1770_vm11, %v2503_v19, %v1719_v35 }
 0x4dc   : > { %v1771_v13 = vsel %vm1770_vm11, %v779_v37, %v1717_v7 }
 0x4de   : > { %v1727_v36 = vpop.permute.xlu0 %1726 }
 0x4df   : > { %v1725_v52 = vpop.permute.xlu1 %1724  ;;  %v1774_v8 = vsel %vm684_vm9, %v1772_v46, %v1727_v36 }
 0x4e0   : > { %v1773_v26 = vsel %vm684_vm9, %v1771_v13, %v1725_v52  ;;  %vm1802_vm9 = vcmask 523264  }
 0x4e2   : > { %v1735_v38 = vpop.permute.xlu0 %1734 }
 0x4e3   : > { %v1733_v42 = vpop.permute.xlu1 %1732  ;;  %v1777_v50 = vsel %vm1775_vm12, %v1774_v8, %v1735_v38 }
 0x4e4   : > { %v1776_v47 = vsel %vm1775_vm12, %v1773_v26, %v1733_v42 }
 0x4e8   : > { %v1743_v16 = vpop.permute.xlu0 %1742 }
 0x4e9   : > { %v1741_v44 = vpop.permute.xlu1 %1740  ;;  %v1780_v53 = vsel %vm1778_vm13, %v1777_v50, %v1743_v16 }
 0x4ea   : > { %v1779_v54 = vsel %vm1778_vm13, %v1776_v47, %v1741_v44 }
 0x4ed   : > { %v1751_v18 = vpop.permute.xlu0 %1750 }
 0x4ee   : > { %v1749_v45 = vpop.permute.xlu1 %1748  ;;  %v1783_v34 = vsel %vm1781_vm14, %v1780_v53, %v1751_v18 }
 0x4ef   : > { %v1782_v63 = vsel %vm1781_vm14, %v1779_v54, %v1749_v45 }
 0x4f6   : > { %v1759_v48 = vpop.permute.xlu0 %1758 }
 0x4f7   : > { %v1757_v39 = vpop.permute.xlu1 %1756  ;;  %v1786_v15 = vsel %vm1784_vm15, %v1783_v34, %v1759_v48 }
 0x4f8   : > { %v1785_v23 = vsel %vm1784_vm15, %v1782_v63, %v1757_v39 }
 0x4fb   : > { %v1767_v58 = vpop.permute.xlu0 %1766 }
 0x4fc   : > { %v1789_v41 = vsel %vm1787_vm2, %v1786_v15, %v1767_v58  ;;  %v1765_v59 = vpop.permute.xlu1 %1764 }
 0x4fd   : > { %v1798_v49 = vadd.f32 %v2361_v56, %v1789_v41  ;;  %v1788_v61 = vsel %vm1787_vm2, %v1785_v23, %v1765_v59 }
 0x4fe   : > { %v1797_v0 = vadd.f32 %v2361_v56, %v1788_v61 }
 0x4ff   : > { %v1800_v2 = vmax.f32 %v1798_v49, 0.0 }
 0x500   : > { %v1799_v60 = vmax.f32 %v1797_v0, 0.0 }
 0x501   : > { %1804 = vst.msk [vmem:[#allocation3 + $0x8] sm:$0xff] %vm1802_vm9, %v1800_v2 }
 0x502   : > { %1803 = vst.msk [vmem:[#allocation3] sm:$0xff] %vm1802_vm9, %v1799_v60 }
 0x503 PF: > { %p1805_p6 = scmp.eq.s32.totalorder %s2928_s13, 1 }
 0x504   : > { %v1812_v55 = vld [vmem:[%s3441_s5] sm:$0xff] (%p1805_p6)  ;;  %v1813_v6 = vld [vmem:[%s3441_s5 + $0x8] sm:$0xff] (%p1805_p6)  ;;  %v1814_v57 = vld [vmem:[%s3441_s5 + $0x10] sm:$0xff] (%p1805_p6)  ;;  %vm1820_vm3 = vcmask (%p1805_p6), 523264   ;;  %v2963_v45 = vmov (%p1805_p6), 0.0|0.0   ;;  %vm2964_vm4 = vmmov (%p1805_p6), 0  }
 0x505   : > { %1809 = sbr.rel (!%p1805_p6) target bundleno = 1738 (0x6ca), region = 72  ;;  %v2677_v1 = vpack.c.bf16 (%p1805_p6), %v1813_v6, %v1812_v55  ;;  %v1815_v40 = vld [vmem:[%s3441_s5 + $0x18] sm:$0xff] (%p1805_p6)  ;;  %v1816_v14 = vld [vmem:[%s3441_s5 + $0x20] sm:$0xff] (%p1805_p6)  ;;  %v1817_v62 = vld [vmem:[%s3441_s5 + $0x28] sm:$0xff] (%p1805_p6)  ;;  %v2965_v46 = vmov (%p1805_p6), 0.0   ;;  %vm2068_vm5 = vcmask (%p1805_p6), 64512  }
 0x506   : > { %v2681_v11 = vpack.c.bf16 (%p1805_p6), %v1815_v40, %v1814_v57  ;;  %v1977_v24 = vld [vmem:[%s3443_s7] sm:$0xff] (%p1805_p6)  ;;  %v1978_v27 = vld [vmem:[%s3443_s7 + $0x8] sm:$0xff] (%p1805_p6)  ;;  %v1979_v17 = vld [vmem:[%s3443_s7 + $0x10] sm:$0xff] (%p1805_p6)  ;;  %v2685_v37 = vpack.c.bf16 (%p1805_p6), %v1817_v62, %v1816_v14  ;;  %vm1975_vm6 = vcmask (%p1805_p6), 130048  }
 0x507   : > { %2678 = vmatprep.subr.bf16.mxu0 (%p1805_p6), %v2677_v1  ;;  %v2696_v5 = vpack.c.bf16 (%p1805_p6), %v1978_v27, %v1977_v24  ;;  %v1980_v19 = vld [vmem:[%s3443_s7 + $0x18] sm:$0xff] (%p1805_p6)  ;;  %v1981_v31 = vld [vmem:[%s3443_s7 + $0x20] sm:$0xff] (%p1805_p6)  ;;  %v1982_v21 = vld [vmem:[%s3443_s7 + $0x28] sm:$0xff] (%p1805_p6) }
 0x508   : > { %2680 = vmatpush3.bf16.msra.mxu0 (%p1805_p6), %v2677_v1  ;;  %v2700_v20 = vpack.c.bf16 (%p1805_p6), %v1980_v19, %v1979_v17  ;;  %v1818_v10 = vld [vmem:[%s3441_s5 + $0x30] sm:$0xff] (%p1805_p6)  ;;  %v1819_v22 = vld [vmem:[%s3441_s5 + $0x38] sm:$0xff] (%p1805_p6)  ;;  %v2704_v43 = vpack.c.bf16 (%p1805_p6), %v1982_v21, %v1981_v31  ;;  %v1985_v29 = vld [vmem:[%s3443_s7 + $0x40] sm:$0xff] (%p1805_p6) }
 0x509   : > { %v1810_v12 = vld [vmem:[#allocation3] sm:$0xff] (%p1805_p6)  ;;  %2682 = vmatprep.subr.bf16.mxu0 (%p1805_p6), %v2681_v11  ;;  %2697 = vmatprep.subr.bf16.mxu1 (%p1805_p6), %v2696_v5  ;;  %v2689_v9 = vpack.c.bf16 (%p1805_p6), %v1819_v22, %v1818_v10  ;;  %v1984_v28 = vld [vmem:[%s3443_s7 + $0x38] sm:$0xff] (%p1805_p6)  ;;  %v1986_v30 = vld [vmem:[%s3443_s7 + $0x48] sm:$0xff] (%p1805_p6) }
 0x50a   : > { %2569 = vmatprep.mubr.msk.f32.mxu0 (%p1805_p6), %vm1820_vm3, %v1810_v12  ;;  %2699 = vmatpush3.bf16.msra.mxu1 (%p1805_p6), %v2696_v5  ;;  %v1983_v25 = vld [vmem:[%s3443_s7 + $0x30] sm:$0xff] (%p1805_p6)  ;;  %v1811_v32 = vld [vmem:[#allocation3 + $0x8] sm:$0xff] (%p1805_p6)  ;;  %v2712_v33 = vpack.c.bf16 (%p1805_p6), %v1986_v30, %v1985_v29  ;;  %v1989_v52 = vld [vmem:[%s3443_s7 + $0x60] sm:$0xff] (%p1805_p6) }
 0x50b   : > { %2701 = vmatprep.subr.bf16.mxu1 (%p1805_p6), %v2700_v20  ;;  %v2708_v51 = vpack.c.bf16 (%p1805_p6), %v1984_v28, %v1983_v25  ;;  %v1987_v35 = vld [vmem:[%s3443_s7 + $0x50] sm:$0xff] (%p1805_p6)  ;;  %v1988_v7 = vld [vmem:[%s3443_s7 + $0x58] sm:$0xff] (%p1805_p6)  ;;  %v1990_v38 = vld [vmem:[%s3443_s7 + $0x68] sm:$0xff] (%p1805_p6) }
 0x50c   : > { %2684 = vmatpush3.bf16.msra.mxu0 %v2681_v11  ;;  %v2716_v36 = vpack.c.bf16 %v1988_v7, %v1987_v35  ;;  %v2720_v42 = vpack.c.bf16 %v1990_v38, %v1989_v52  ;;  %v1991_v16 = vld [vmem:[%s3443_s7 + $0x70] sm:$0xff]  ;;  %v1992_v44 = vld [vmem:[%s3443_s7 + $0x78] sm:$0xff]  ;;  %v1904_v39 = vld [vmem:[%s3442_s6] sm:$0xff] }
 0x50d   : > { %2686 = vmatprep.subr.bf16.mxu0 %v2685_v37  ;;  %v2724_v18 = vpack.c.bf16 %v1992_v44, %v1991_v16 }
 0x50e   : > { %2703 = vmatpush3.bf16.msra.mxu1 %v2700_v20 }
 0x50f   : > { %2705 = vmatprep.subr.bf16.mxu1 %v2704_v43 }
 0x510   : > { %2688 = vmatpush3.bf16.msra.mxu0 %v2685_v37 }
 0x511   : > { %2690 = vmatprep.subr.bf16.mxu0 %v2689_v9 }
 0x512   : > { %2707 = vmatpush3.bf16.msra.mxu1 %v2704_v43 }
 0x513   : > { %2709 = vmatprep.subr.bf16.mxu1 %v2708_v51 }
 0x514   : > { %2692 = vmatpush3.bf16.msra.mxu0 %v2689_v9 }
 0x515   : > { %2693 = vmatprep.subr.bf16.mxu0 %v2963_v45 }
 0x516   : > { %2711 = vmatpush3.bf16.msra.mxu1 %v2708_v51 }
 0x517   : > { %2570 = vmatmul.mubr.msk.f32.vlgmr.msra.gmra.mrb[0].mxu0 %vm1820_vm3, %v1811_v32  ;;  %2713 = vmatprep.subr.bf16.mxu1 %v2712_v33 }
 0x518   : > { %2576 = vmatprep.mubr.msk.f32.mxu0 %vm2964_vm4, %v2965_v46 }
 0x51a   : > { %2715 = vmatpush3.bf16.msra.mxu1 %v2712_v33 }
 0x51b   : > { %2717 = vmatprep.subr.bf16.mxu1 %v2716_v36 }
 0x51e   : > { %2719 = vmatpush3.bf16.msra.mxu1 %v2716_v36 }
 0x51f   : > { %2721 = vmatprep.subr.bf16.mxu1 %v2720_v42 }
 0x522   : > { %2723 = vmatpush3.bf16.msra.mxu1 %v2720_v42 }
 0x523   : > { %2725 = vmatprep.subr.bf16.mxu1 %v2724_v18 }
 0x526   : > { %2727 = vmatpush3.bf16.msra.mxu1 %v2724_v18 }
 0x5ea   : > { %v2571_v48 = vpop.f32.mrb[0].mxu0 }
 0x5eb   : > { %1903 = vst [vmem:[#allocation4 + $0x8] sm:$0xff] %v2571_v48  ;;  %v1893_v13 = vpop.f32.mrb[1].mxu0 }
 0x5ec   : > { %1902 = vst [vmem:[#allocation4] sm:$0xff] %v1893_v13  ;;  %v2694_v8 = vpack.c.bf16 %v2571_v48, %v1893_v13  ;;  %2611 = vmatprep.mubr.f32.mxu1 %v1893_v13 }
 0x5ed   : > { %2612 = vmatmul.mubr.f32.vlgmr.msra.gmra.mrb[0].mxu1 %v2571_v48 }
 0x5ee   : > { %2695 = vmatpush3.bf16.xpose.msra.mxu0 %v2694_v8 }
 0x5f5   : > { %2577 = vmatmul.mubr.f32.vlgmr.msra.gmra.mrb[2].mxu0 %v1904_v39 }
 0x6c0   : > { %v2613_v26 = vpop.f32.mrb[0].mxu1 }
 0x6c1   : > { %2070 = vst.msk [vmem:[#allocation8 + $0x8] sm:$0xff] %vm2068_vm5, %v2613_v26  ;;  %v2059_v50 = vpop.f32.mrb[1].mxu1 }
 0x6c2   : > { %2069 = vst.msk [vmem:[#allocation8] sm:$0xff] %vm2068_vm5, %v2059_v50 }
 0x6c8   : > { %v1971_v47 = vpop.f32.mrb[2].mxu0 }
 0x6c9   : > { %1976 = vst.msk [vmem:[#allocation7] sm:$0xff] %vm1975_vm6, %v1971_v47  ;;  %v2578_v53 = vpop.f32.mrb[3].mxu0 }
 0x6ca PF: > { %p2365_p7 = scmp.ne.s32.totalorder %s2928_s13, 1 }
 0x6cb   : > { %v2077_v54 = vld [vmem:[#allocation8] sm:$0xff] (!%p2365_p7)  ;;  %v2966_v34 = vmov (!%p2365_p7), 0   ;;  %v2078_v56 = vld [vmem:[#allocation8 + $0x8] sm:$0xff] (!%p2365_p7)  ;;  %vm2104_vm8 = vcmask (!%p2365_p7), 130048   ;;  %v2074_v4 = vld [vmem:[#allocation4] sm:$0xff] (!%p2365_p7)  ;;  %v2215_v22 = vlaneseq (!%p2365_p7) }
 0x6cc   : > { %2073 = sbr.rel (%p2365_p7) target bundleno = 2731 (0xaab), region = 76  ;;  %2897 = vset.pattern.permute.xlu0 (!%p2365_p7), %v2966_v34  ;;  %v2075_v5 = vld [vmem:[#allocation4 + $0x8] sm:$0xff] (!%p2365_p7)  ;;  %v2367_v9 = vld [vmem:[%s3444_s8] ss:$0 sm:$0xff] (!%p2365_p7) }
 0x6cd   : > { %2082 = vperm.xlu0 (!%p2365_p7), %2897, %v2077_v54   ;;  %v2728_v17 = vpack.c.bf16 (!%p2365_p7), %v2075_v5, %v2074_v4  ;;  %v2216_v43 = vand.u32 (!%p2365_p7), 127, %v2215_v22 }
 0x6cf   : > { %2729 = vmatprep.subr.bf16.mxu0 (!%p2365_p7), %v2728_v17 }
 0x6d0   : > { %v2366_v63 = vld [vmem:[#allocation7] ss:$0 sm:$0xff] (!%p2365_p7)  ;;  %2731 = vmatpush3.bf16.msra.mxu0 (!%p2365_p7), %v2728_v17 }
 0x6d1   : > { %2087 = vperm.xlu0 (!%p2365_p7), %2897, %v2078_v56  }
 0x74c   : > { %v2083_v15 = vpop.permute.xlu0 %2082 }
 0x74d   : > { %v2094_v58 = vadd.f32 %v2366_v63, %v2083_v15 }
 0x74f   : > { %v2098_v23 = vmul.f32 0.2, %v2094_v58  ;;  %vm2096_vm7 = vcmp.ge.f32.partialorder %v2094_v58, 0.0 }
 0x750   : > { %v2088_v41 = vpop.permute.xlu0 %2087 }
 0x751   : > { %v2095_v59 = vadd.f32 %v2366_v63, %v2088_v41  ;;  %v2100_v49 = vsel %vm2096_vm7, %v2094_v58, %v2098_v23 }
 0x752   : > { %v2102_v61 = vsel %vm387_vm0, %v2100_v49, -1e+30  ;;  %vm2217_vm0 = vcmp.lt.s32.totalorder %v2216_v43, 8 }
 0x753   : > { %v2099_v0 = vmul.f32 0.2, %v2095_v59  ;;  %v2105_v2 = vsel %vm2104_vm8, %v2102_v61, -inf  ;;  %vm2097_vm10 = vcmp.ge.f32.partialorder %v2095_v59, 0.0 }
 0x754   : > { %2106 = vmax.xlane.f32.xlu1 %v2105_v2 }
 0x755   : > { %v2101_v60 = vsel %vm2097_vm10, %v2095_v59, %v2099_v0 }
 0x756   : > { %v2103_v55 = vsel %vm388_vm1, %v2101_v60, -1e+30 }
 0x757   : > { %v2108_v6 = vsel %vm2104_vm8, %v2103_v55, -inf }
 0x758   : > { %2109 = vmax.xlane.f32.xlu1 %v2108_v6 }
 0x7e1   : > { %v2107_v57 = vpop.xlane.xlu1 %2106 }
 0x7e2   : > { %v2111_v1 = vsub.f32 %v2102_v61, %v2107_v57 }
 0x7e4   : > { %v2113_v40 = vmul.f32 1.442695, %v2111_v1 }
 0x7e5   : > { %v2110_v11 = vpop.xlane.xlu1 %2109 }
 0x7e6   : > { %2898 = vpow2.f32 %v2113_v40  ;;  %v2112_v14 = vsub.f32 %v2103_v55, %v2110_v11 }
 0x7e8   : > { %v2115_v3 = vmul.f32 1.442695, %v2112_v14 }
 0x7ea   : > { %2900 = vpow2.f32 %v2115_v3 }
 0x7f0   : > { %v2899_v62 = vpop.eup %2898 }
 0x7f1   : > { %v2117_v12 = vsel %vm2104_vm8, %v2899_v62, 0.0 }
 0x7f2   : > { %2118 = vadd.xlane.f32.xlu0 %v2117_v12 }
 0x7f4   : > { %v2901_v24 = vpop.eup %2900 }
 0x7f5   : > { %v2120_v27 = vsel %vm2104_vm8, %v2901_v24, 0.0 }
 0x7f6   : > { %2121 = vadd.xlane.f32.xlu1 %v2120_v27 }
 0x87f   : > { %v2119_v19 = vpop.xlane.xlu0 %2118 }
 0x880   : > { %2902 = vrcp.f32 %v2119_v19 }
 0x883   : > { %v2122_v37 = vpop.xlane.xlu1 %2121 }
 0x884   : > { %2904 = vrcp.f32 %v2122_v37 }
 0x88a   : > { %v2903_v20 = vpop.eup %2902 }
 0x88b   : > { %v2125_v31 = vmul.f32 %v2903_v20, %v2899_v62 }
 0x88d   : > { %2618 = vmatprep.mubr.msk.f32.mxu0 %vm2104_vm8, %v2125_v31 }
 0x88e   : > { %v2905_v21 = vpop.eup %2904 }
 0x88f   : > { %v2126_v10 = vmul.f32 %v2905_v21, %v2901_v24 }
 0x891   : > { %2619 = vmatmul.mubr.msk.f32.vlgmr.msra.gmra.mrb[0].mxu0 %vm2104_vm8, %v2126_v10 }
 0x964   : > { %v2620_v25 = vpop.f32.mrb[0].mxu0 }
 0x965   : > { %v2206_v28 = vpop.f32.mrb[1].mxu0  ;;  %v2212_v29 = vadd.f32 %v2620_v25, %v2367_v9 }
 0x966   : > { %v2207_v51 = vadd.f32 %v2367_v9, %v2206_v28 }
 0x967   : > { %v2219_v32 = vsel %vm2217_vm0, %v2212_v29, -1e+30 }
 0x968   : > { %v2218_v30 = vsel %vm2217_vm0, %v2207_v51, -1e+30 }
 0x969   : > { %2220 = vmax.xlane.f32.xlu1 %v2218_v30 }
 0x96d   : > { %2222 = vmax.xlane.f32.xlu1 %v2219_v32 }
 0x9f6   : > { %v2221_v33 = vpop.xlane.xlu1 %2220 }
 0x9f7   : > { %v2224_v35 = vsub.f32 %v2218_v30, %v2221_v33 }
 0x9f9   : > { %v2226_v7 = vmul.f32 1.442695, %v2224_v35 }
 0x9fa   : > { %v2223_v36 = vpop.xlane.xlu1 %2222 }
 0x9fb   : > { %2906 = vpow2.f32 %v2226_v7  ;;  %v2225_v52 = vsub.f32 %v2219_v32, %v2223_v36 }
 0x9fd   : > { %v2228_v38 = vmul.f32 1.442695, %v2225_v52 }
 0x9ff   : > { %2908 = vpow2.f32 %v2228_v38 }
 0xa05   : > { %v2907_v42 = vpop.eup %2906 }
 0xa06   : > { %2230 = vadd.xlane.f32.xlu1 %v2907_v42 }
 0xa09   : > { %v2909_v16 = vpop.eup %2908 }
 0xa0a   : > { %2232 = vadd.xlane.f32.xlu1 %v2909_v16 }
 0xa93   : > { %v2231_v44 = vpop.xlane.xlu1 %2230 }
 0xa94   : > { %2910 = vlog2.f32 %v2231_v44 }
 0xa97   : > { %v2233_v18 = vpop.xlane.xlu1 %2232 }
 0xa98   : > { %2912 = vlog2.f32 %v2233_v18 }
 0xa9e   : > { %v2911_v45 = vpop.eup %2910 }
 0xa9f   : > { %v2235_v46 = vmul.f32 0.6931472, %v2911_v45 }
 0xaa1   : > { %v2238_v48 = vadd.f32 %v2235_v46, %v2221_v33 }
 0xaa2   : > { %v2913_v13 = vpop.eup %2912 }
 0xaa3   : > { %v2240_v8 = vsub.f32 %v2207_v51, %v2238_v48  ;;  %v2237_v39 = vmul.f32 0.6931472, %v2913_v13 }
 0xaa5   : > { %v2242_v26 = vsel %vm2217_vm0, %v2240_v8, 0.0  ;;  %v2239_v50 = vadd.f32 %v2237_v39, %v2223_v36 }
 0xaa6   : > { %2244 = vst [vmem:[%s3446_s10] sm:$0xff] %v2242_v26 }
 0xaa7   : > { %v2241_v47 = vsub.f32 %v2212_v29, %v2239_v50 }
 0xaa9   : > { %v2243_v53 = vsel %vm2217_vm0, %v2241_v47, 0.0 }
 0xaaa   : > { %2245 = vst [vmem:[%s3446_s10 + $0x8] sm:$0xff] %v2243_v53 }
 0xaab PF: > { %s20_s15 = sadd.s32 1, %s2936_s15   ;;  %s3447_s13 = smov %s2932_s14 }
 0xaac   : > { %p17_p8 = scmp.ge.s32.totalorder %s20_s15, 4   ;;  %s3448_s14 = smov %s3450_s16 }
 0xaae   :  { %19 = sbr.rel (!%p17_p8) target bundleno = 2 (0x2), region = 109 }

</bundles_post_ra>
